<compile_context>
chip_gen: v7x
topology: tpu7x:2x2x1
jax: 0.10.0
libtpu: 0.0.40
codegen_flags: <defaults>
</compile_context>

<pallas_src>
import functools

import jax
import jax.numpy as jnp
import numpy as np
from jax import lax
from jax.experimental import pallas as pl
from jax.experimental.pallas import tpu as pltpu


# --------------------------------------------------------------------------
# Kernel 1/2: one fully fused TransformerConv layer (+ ReLU)
# --------------------------------------------------------------------------
def _conv_layer_kernel(x_ref, wf_ref, bf_ref, adj_ref, o_ref, *, heads, ch):
    """o = relu( multi_head_attention(x, adj) + lin_skip(x) )

    x_ref   : [N, Fin]   bf16 node features
    wf_ref  : [Fin, 4*Hd] bf16 fused [Wq*scale | Wk | Wv | Wskip] (transposed)
    bf_ref  : [1, 4*Hd]  f32  fused biases (bq already scaled)
    adj_ref : [N, N]     int8 adj[dst, src] = 1 iff edge src -> dst
    o_ref   : [N, Hd]    bf16
    """
    hd = heads * ch

    # Fused projection: one 128-lane bf16 MXU pass, f32 accumulation.
    proj = jnp.dot(x_ref[...], wf_ref[...],
                   preferred_element_type=jnp.float32) + bf_ref[...]
    # Single bf16 cast of q|k|v (hoisted out of the head loop); skip stays f32.
    qkv = proj[:, :3 * hd].astype(jnp.bfloat16)        # [N, 3*Hd]
    skip = proj[:, 3 * hd:]                            # [N, Hd]   f32

    # Additive mask built once from the narrow int8 tile (upcast to f32 so the
    # -1e30 constant is exact).  Masked scores underflow to exactly 0 in exp,
    # so no `* adj` is needed after the exponent.
    adj_f = adj_ref[...].astype(jnp.float32)
    neg_bias = (adj_f - 1.0) * 1e30                    # 0 on edges, -1e30 off
    # Zero-in-degree rows would otherwise get a uniform softmax; gate them.
    deg_gate = (jnp.sum(adj_f, axis=-1, keepdims=True) > 0.0).astype(jnp.float32)

    # All heads inside a single kernel invocation (static unrolled loop).
    dn_qkt = (((1,), (1,)), ((), ()))                  # contract feature dim
    out_heads = []
    for h in range(heads):
        lo, hi = h * ch, (h + 1) * ch
        qh = qkv[:, lo:hi]                             # bf16, scale pre-folded
        kh = qkv[:, hd + lo:hd + hi]
        vh = qkv[:, 2 * hd + lo:2 * hd + hi]

        s = lax.dot_general(qh, kh, dn_qkt,
                            preferred_element_type=jnp.float32) + neg_bias
        m = jnp.max(s, axis=-1, keepdims=True)
        p = jnp.exp(s - m)                             # masked entries -> 0.0
        denom = jnp.sum(p, axis=-1, keepdims=True)     # >= 1, never zero
        inv = pl.reciprocal(denom, approx=True)        # EUP slot
        alpha = (p * inv).astype(jnp.bfloat16)

        out_heads.append(jnp.dot(alpha, vh, preferred_element_type=jnp.float32))

    # One lane-dense store: concat heads, gate, skip-add, ReLU, bf16 cast.
    attn = jnp.concatenate(out_heads, axis=-1) * deg_gate      # [N, Hd] f32
    o_ref[...] = jnp.maximum(attn + skip, 0.0).astype(o_ref.dtype)


def transformer_conv_pallas(x, adj, wf, bf, heads):
    """One TransformerConv layer (+ ReLU) as a single pallas_call."""
    n, fin = x.shape
    hd4 = wf.shape[1]
    hd = hd4 // 4
    ch = hd // heads
    kernel = functools.partial(_conv_layer_kernel, heads=heads, ch=ch)
    # TODO(synk): at realistic N use grid=(cdiv(N,tile_n), cdiv(N,tile_k)) with
    # dimension_semantics=("parallel","arbitrary"), online-softmax scratch, a
    # separate K/V pass, and an explicit vmem_limit_bytes for v7x (64 MiB).
    return pl.pallas_call(
        kernel,
        grid=(1,),
        in_specs=[
            pl.BlockSpec((n, fin), lambda i: (0, 0)),
            pl.BlockSpec((fin, hd4), lambda i: (0, 0)),
            pl.BlockSpec((1, hd4), lambda i: (0, 0)),
            pl.BlockSpec((n, n), lambda i: (0, 0)),
        ],
        out_specs=pl.BlockSpec((n, hd), lambda i: (0, 0)),
        out_shape=jax.ShapeDtypeStruct((n, hd), jnp.bfloat16),
        compiler_params=pltpu.CompilerParams(dimension_semantics=("parallel",)),
    )(x, wf, bf, adj)


# --------------------------------------------------------------------------
# Kernel 3: global_mean_pool + lin_mem + lin_time fused
# --------------------------------------------------------------------------
def _pool_heads_kernel(pmat_ref, x_ref, w_ref, b_ref, o_ref):
    # pooled = P @ x stays in VMEM; heads matmul is tiny, kept in f32.
    pooled = jnp.dot(pmat_ref[...], x_ref[...], preferred_element_type=jnp.float32)
    o_ref[...] = (
        jnp.dot(pooled, w_ref[...], preferred_element_type=jnp.float32) + b_ref[...]
    )


def pool_and_heads_pallas(pool_mat, x, w, b):
    """pool_mat: [G, N] bf16 normalized one-hot; x: [N, F] bf16; w: [F, 2*out]; b: [1, 2*out]."""
    g, n = pool_mat.shape
    f = x.shape[1]
    o = w.shape[1]
    # TODO(synk): at scale, tile over N with an accumulator output (constant
    # out BlockSpec + pl.when init/finalize) driven by scalar-prefetched batch
    # ids instead of materializing pool_mat.
    return pl.pallas_call(
        _pool_heads_kernel,
        grid=(1,),
        in_specs=[
            pl.BlockSpec((g, n), lambda i: (0, 0)),
            pl.BlockSpec((n, f), lambda i: (0, 0)),
            pl.BlockSpec((f, o), lambda i: (0, 0)),
            pl.BlockSpec((1, o), lambda i: (0, 0)),
        ],
        out_specs=pl.BlockSpec((g, o), lambda i: (0, 0)),
        out_shape=jax.ShapeDtypeStruct((g, o), jnp.float32),
    )(pool_mat, x, w, b)


# --------------------------------------------------------------------------
# Weight fusion (done ONCE, outside jit): concat q|k|v|skip, fold 1/sqrt(ch)
# into Wq/bq, cast matmul weights to bf16.
# --------------------------------------------------------------------------
def prepare_fused_params(params, heads):
    def fuse_conv(p):
        hd = p["wq"].shape[0]
        ch = hd // heads
        scale = 1.0 / float(np.sqrt(ch))
        wf = jnp.concatenate(
            [(p["wq"] * scale).T, p["wk"].T, p["wv"].T, p["wskip"].T], axis=1)
        bf = jnp.concatenate(
            [p["bq"] * scale, p["bk"], p["bv"], p["bskip"]]).reshape(1, -1)
        return wf.astype(jnp.bfloat16), bf.astype(jnp.float32)

    wf1, bf1 = fuse_conv(params["conv1"])
    wf2, bf2 = fuse_conv(params["conv2"])
    w_heads = jnp.concatenate(
        [params["lin_mem"][0].T, params["lin_time"][0].T], axis=1).astype(jnp.float32)
    b_heads = jnp.concatenate(
        [params["lin_mem"][1], params["lin_time"][1]]).reshape(1, -1).astype(jnp.float32)
    return dict(wf1=wf1, bf1=bf1, wf2=wf2, bf2=bf2,
                w_heads=w_heads, b_heads=b_heads)


# --------------------------------------------------------------------------
# Forward pass (3 pallas_calls total)
# --------------------------------------------------------------------------
@functools.partial(jax.jit, static_argnames=("heads", "out_channels"))
def graph_transformer_forward(x, adj, pool_mat, fused, *, heads, out_channels):
    h1 = transformer_conv_pallas(x, adj, fused["wf1"], fused["bf1"], heads)   # bf16
    h2 = transformer_conv_pallas(h1, adj, fused["wf2"], fused["bf2"], heads)  # bf16
    out = pool_and_heads_pallas(pool_mat, h2, fused["w_heads"], fused["b_heads"])
    mem = out[:, :out_channels]
    tim = out[:, out_channels:]
    return jnp.squeeze(mem), jnp.squeeze(tim)


# --------------------------------------------------------------------------
# Pure-jnp f32 reference (same math, no Pallas) for a sanity check
# --------------------------------------------------------------------------
def _ref_conv(x, adj, p, heads):
    n = x.shape[0]
    q = x @ p["wq"].T + p["bq"]
    k = x @ p["wk"].T + p["bk"]
    v = x @ p["wv"].T + p["bv"]
    c = q.shape[1] // heads
    qh = q.reshape(n, heads, c).transpose(1, 0, 2)
    kh = k.reshape(n, heads, c).transpose(1, 0, 2)
    vh = v.reshape(n, heads, c).transpose(1, 0, 2)
    s = jnp.einsum("hic,hjc->hij", qh, kh) / np.sqrt(c)
    s = jnp.where(adj[None] > 0, s, -1e30)
    pp = jnp.exp(s - jnp.max(s, axis=-1, keepdims=True)) * adj[None]
    denom = jnp.sum(pp, axis=-1, keepdims=True)
    alpha = pp / jnp.maximum(denom, 1e-30)
    o = jnp.einsum("hij,hjc->hic", alpha, vh).transpose(1, 0, 2).reshape(n, heads * c)
    skip = x @ p["wskip"].T + p["bskip"]
    return o + skip


def _ref_forward(x, adj, pool_mat, params, heads):
    h1 = jnp.maximum(_ref_conv(x, adj, params["conv1"], heads), 0.0)
    h2 = jnp.maximum(_ref_conv(h1, adj, params["conv2"], heads), 0.0)
    pooled = pool_mat @ h2
    mem = pooled @ params["lin_mem"][0].T + params["lin_mem"][1]
    tim = pooled @ params["lin_time"][0].T + params["lin_time"][1]
    return jnp.squeeze(mem), jnp.squeeze(tim)


# --------------------------------------------------------------------------
# Deterministic parameter initialization (shapes implied by __init__)
# --------------------------------------------------------------------------
def init_params(key, num_node_features, hidden, out_channels, heads):
    def lin(k, out_dim, in_dim):
        k1, k2 = jax.random.split(k)
        w = jax.random.normal(k1, (out_dim, in_dim), jnp.float32) * 0.1
        b = jax.random.normal(k2, (out_dim,), jnp.float32) * 0.1
        return w, b

    def conv(ks, in_dim):
        wq, bq = lin(ks[0], hidden, in_dim)
        wk, bk = lin(ks[1], hidden, in_dim)
        wv, bv = lin(ks[2], hidden, in_dim)
        ws, bs = lin(ks[3], hidden, in_dim)
        return dict(wq=wq, bq=bq, wk=wk, bk=bk, wv=wv, bv=bv, wskip=ws, bskip=bs)

    keys = jax.random.split(key, 10)
    return {
        "conv1": conv(keys[0:4], num_node_features),
        "conv2": conv(keys[4:8], hidden),
        "lin_mem": lin(keys[8], out_channels, hidden),
        "lin_time": lin(keys[9], out_channels, hidden),
    }


# --------------------------------------------------------------------------
if __name__ == "__main__":
    heads = 4
    hidden_channels = 32          # 4*hidden = 128-lane fused projection
    out_channels = 1
    num_node_features = 8
    n_per_graph, num_graphs = 8, 2
    num_nodes = n_per_graph * num_graphs

    key = jax.random.PRNGKey(0)
    k_x, k_p = jax.random.split(key)

    # Node features  [N, F]
    x = jax.random.normal(k_x, (num_nodes, num_node_features), jnp.float32)

    # edge_index [2, E]: bidirectional ring within each graph
    edges = []
    for g in range(num_graphs):
        off = g * n_per_graph
        for i in range(n_per_graph):
            j = (i + 1) % n_per_graph
            edges.append((off + i, off + j))
            edges.append((off + j, off + i))
    edge_index = jnp.asarray(np.array(edges, dtype=np.int32).T)   # [2, E]
    batch = jnp.asarray(
        np.repeat(np.arange(num_graphs, dtype=np.int32), n_per_graph))

    # Dense adjacency mask: adj[dst, src] = 1 iff edge src -> dst exists.
    adj = jnp.zeros((num_nodes, num_nodes), jnp.float32)
    adj = adj.at[edge_index[1], edge_index[0]].set(1.0)

    # global_mean_pool as a normalized one-hot matrix P: [G, N]
    onehot = (batch[None, :] == jnp.arange(num_graphs)[:, None]).astype(jnp.float32)
    counts = jnp.maximum(jnp.sum(onehot, axis=1, keepdims=True), 1.0)
    pool_mat = onehot / counts

    params = init_params(k_p, num_node_features, hidden_channels,
                         out_channels, heads)
    fused = prepare_fused_params(params, heads)       # once, outside jit

    # Narrow-dtype device inputs for the kernels (adj int8, features bf16).
    x_bf16 = x.astype(jnp.bfloat16)
    adj_i8 = adj.astype(jnp.int8)
    pool_bf16 = pool_mat.astype(jnp.bfloat16)

    mem_pred, time_pred = graph_transformer_forward(
        x_bf16, adj_i8, pool_bf16, fused, heads=heads, out_channels=out_channels)
    jax.block_until_ready((mem_pred, time_pred))

    # Reference is pure f32; kernel uses bf16 MXU operands, a bf16 layer-1
    # intermediate and approx reciprocal, so compare with a modest tolerance.
    mem_ref, time_ref = _ref_forward(x, adj, pool_mat, params, heads)
    np.testing.assert_allclose(np.asarray(mem_pred), np.asarray(mem_ref),
                               rtol=5e-2, atol=5e-2)
    np.testing.assert_allclose(np.asarray(time_pred), np.asarray(time_ref),
                               rtol=5e-2, atol=5e-2)

    print("KERNEL_OK")
</pallas_src>

<mosaic_0001>
module attributes {stable_mosaic.version = 11 : i64} {
  func.func @_conv_layer_kernel(%arg0: i32, %arg1: memref<16x32xbf16, #tpu.memory_space<vmem>>, %arg2: memref<32x128xbf16, #tpu.memory_space<vmem>>, %arg3: memref<1x128xf32, #tpu.memory_space<vmem>>, %arg4: memref<16x16xi8, #tpu.memory_space<vmem>>, %arg5: memref<16x32xbf16, #tpu.memory_space<vmem>>) attributes {dimension_semantics = [#tpu.dimension_semantics<parallel>], iteration_bounds = array<i64: 1>, scalar_prefetch = 0 : i64, scratch_operands = 0 : i64, tpu.core_type = #tpu.core_type<tc>, window_params = [{pipeline_mode = #tpu.pipeline_mode<synchronous>, transform_indices = @transform_0, window_bounds = array<i64: 16, 32>}, {pipeline_mode = #tpu.pipeline_mode<synchronous>, transform_indices = @transform_1, window_bounds = array<i64: 32, 128>}, {pipeline_mode = #tpu.pipeline_mode<synchronous>, transform_indices = @transform_2, window_bounds = array<i64: 1, 128>}, {pipeline_mode = #tpu.pipeline_mode<synchronous>, transform_indices = @transform_3, window_bounds = array<i64: 16, 16>}, {pipeline_mode = #tpu.pipeline_mode<synchronous>, transform_indices = @transform_4, window_bounds = array<i64: 16, 32>}]} {
    %c0 = arith.constant 0 : index
    %c0_0 = arith.constant 0 : index
    %0 = vector.load %arg1[%c0, %c0_0] : memref<16x32xbf16, #tpu.memory_space<vmem>>, vector<16x32xbf16>
    %c0_1 = arith.constant 0 : index
    %c0_2 = arith.constant 0 : index
    %1 = vector.load %arg2[%c0_1, %c0_2] : memref<32x128xbf16, #tpu.memory_space<vmem>>, vector<32x128xbf16>
    %cst = arith.constant dense<0.000000e+00> : vector<16x128xf32>
    %2 = tpu.matmul %0, %1, %cst {dimension_numbers = #tpu.dot_dimension_numbers<[1], [0], [0], [1], [0, 0, 1, 1], [], []>} : vector<16x32xbf16>, vector<32x128xbf16>, vector<16x128xf32> -> vector<16x128xf32>
    %c0_3 = arith.constant 0 : index
    %c0_4 = arith.constant 0 : index
    %3 = vector.load %arg3[%c0_3, %c0_4] : memref<1x128xf32, #tpu.memory_space<vmem>>, vector<1x128xf32>
    %4 = vector.broadcast %3 : vector<1x128xf32> to vector<16x128xf32>
    %5 = arith.addf %2, %4 : vector<16x128xf32>
    %6 = vector.extract_strided_slice %5 {offsets = [0, 0], sizes = [16, 96], strides = [1, 1]} : vector<16x128xf32> to vector<16x96xf32>
    %7 = arith.truncf %6 : vector<16x96xf32> to vector<16x96xbf16>
    %8 = vector.extract_strided_slice %5 {offsets = [0, 96], sizes = [16, 32], strides = [1, 1]} : vector<16x128xf32> to vector<16x32xf32>
    %c0_5 = arith.constant 0 : index
    %c0_6 = arith.constant 0 : index
    %9 = vector.load %arg4[%c0_5, %c0_6] : memref<16x16xi8, #tpu.memory_space<vmem>>, vector<16x16xi8>
    %10 = arith.sitofp %9 : vector<16x16xi8> to vector<16x16xf32>
    %cst_7 = arith.constant 1.000000e+00 : f32
    %11 = vector.broadcast %cst_7 : f32 to vector<16x16xf32>
    %12 = arith.subf %10, %11 : vector<16x16xf32>
    %cst_8 = arith.constant 1.000000e+30 : f32
    %13 = vector.broadcast %cst_8 : f32 to vector<16x16xf32>
    %14 = arith.mulf %12, %13 : vector<16x16xf32>
    %cst_9 = arith.constant dense<0.000000e+00> : vector<16xf32>
    %15 = vector.multi_reduction <add>, %10, %cst_9 [1] : vector<16x16xf32> to vector<16xf32>
    %16 = vector.shape_cast %15 : vector<16xf32> to vector<16x1xf32>
    %cst_10 = arith.constant 0.000000e+00 : f32
    %17 = vector.broadcast %cst_10 : f32 to vector<16x1xf32>
    %18 = arith.cmpf ogt, %16, %17 : vector<16x1xf32>
    %19 = arith.extui %18 : vector<16x1xi1> to vector<16x1xi32>
    %20 = arith.sitofp %19 : vector<16x1xi32> to vector<16x1xf32>
    %21 = vector.extract_strided_slice %7 {offsets = [0, 0], sizes = [16, 8], strides = [1, 1]} : vector<16x96xbf16> to vector<16x8xbf16>
    %22 = vector.extract_strided_slice %7 {offsets = [0, 32], sizes = [16, 8], strides = [1, 1]} : vector<16x96xbf16> to vector<16x8xbf16>
    %23 = vector.extract_strided_slice %7 {offsets = [0, 64], sizes = [16, 8], strides = [1, 1]} : vector<16x96xbf16> to vector<16x8xbf16>
    %cst_11 = arith.constant dense<0.000000e+00> : vector<16x16xf32>
    %24 = tpu.matmul %21, %22, %cst_11 {dimension_numbers = #tpu.dot_dimension_numbers<[1], [1], [0], [0], [0, 0, 1, 0], [], []>} : vector<16x8xbf16>, vector<16x8xbf16>, vector<16x16xf32> -> vector<16x16xf32>
    %25 = arith.addf %24, %14 : vector<16x16xf32>
    %cst_12 = arith.constant dense<0xFF800000> : vector<16xf32>
    %26 = vector.multi_reduction <maximumf>, %25, %cst_12 [1] : vector<16x16xf32> to vector<16xf32>
    %27 = vector.shape_cast %26 : vector<16xf32> to vector<16x1xf32>
    %28 = vector.broadcast %27 : vector<16x1xf32> to vector<16x16xf32>
    %29 = arith.subf %25, %28 : vector<16x16xf32>
    %30 = math.exp %29 : vector<16x16xf32>
    %cst_13 = arith.constant dense<0.000000e+00> : vector<16xf32>
    %31 = vector.multi_reduction <add>, %30, %cst_13 [1] : vector<16x16xf32> to vector<16xf32>
    %32 = vector.shape_cast %31 : vector<16xf32> to vector<16x1xf32>
    %33 = tpu.reciprocal %32 {approx = true} : vector<16x1xf32> -> vector<16x1xf32>
    %34 = vector.broadcast %33 : vector<16x1xf32> to vector<16x16xf32>
    %35 = arith.mulf %30, %34 : vector<16x16xf32>
    %36 = arith.truncf %35 : vector<16x16xf32> to vector<16x16xbf16>
    %cst_14 = arith.constant dense<0.000000e+00> : vector<16x8xf32>
    %37 = tpu.matmul %36, %23, %cst_14 {dimension_numbers = #tpu.dot_dimension_numbers<[1], [0], [0], [1], [0, 0, 1, 1], [], []>} : vector<16x16xbf16>, vector<16x8xbf16>, vector<16x8xf32> -> vector<16x8xf32>
    %38 = vector.extract_strided_slice %7 {offsets = [0, 8], sizes = [16, 8], strides = [1, 1]} : vector<16x96xbf16> to vector<16x8xbf16>
    %39 = vector.extract_strided_slice %7 {offsets = [0, 40], sizes = [16, 8], strides = [1, 1]} : vector<16x96xbf16> to vector<16x8xbf16>
    %40 = vector.extract_strided_slice %7 {offsets = [0, 72], sizes = [16, 8], strides = [1, 1]} : vector<16x96xbf16> to vector<16x8xbf16>
    %cst_15 = arith.constant dense<0.000000e+00> : vector<16x16xf32>
    %41 = tpu.matmul %38, %39, %cst_15 {dimension_numbers = #tpu.dot_dimension_numbers<[1], [1], [0], [0], [0, 0, 1, 0], [], []>} : vector<16x8xbf16>, vector<16x8xbf16>, vector<16x16xf32> -> vector<16x16xf32>
    %42 = arith.addf %41, %14 : vector<16x16xf32>
    %cst_16 = arith.constant dense<0xFF800000> : vector<16xf32>
    %43 = vector.multi_reduction <maximumf>, %42, %cst_16 [1] : vector<16x16xf32> to vector<16xf32>
    %44 = vector.shape_cast %43 : vector<16xf32> to vector<16x1xf32>
    %45 = vector.broadcast %44 : vector<16x1xf32> to vector<16x16xf32>
    %46 = arith.subf %42, %45 : vector<16x16xf32>
    %47 = math.exp %46 : vector<16x16xf32>
    %cst_17 = arith.constant dense<0.000000e+00> : vector<16xf32>
    %48 = vector.multi_reduction <add>, %47, %cst_17 [1] : vector<16x16xf32> to vector<16xf32>
    %49 = vector.shape_cast %48 : vector<16xf32> to vector<16x1xf32>
    %50 = tpu.reciprocal %49 {approx = true} : vector<16x1xf32> -> vector<16x1xf32>
    %51 = vector.broadcast %50 : vector<16x1xf32> to vector<16x16xf32>
    %52 = arith.mulf %47, %51 : vector<16x16xf32>
    %53 = arith.truncf %52 : vector<16x16xf32> to vector<16x16xbf16>
    %cst_18 = arith.constant dense<0.000000e+00> : vector<16x8xf32>
    %54 = tpu.matmul %53, %40, %cst_18 {dimension_numbers = #tpu.dot_dimension_numbers<[1], [0], [0], [1], [0, 0, 1, 1], [], []>} : vector<16x16xbf16>, vector<16x8xbf16>, vector<16x8xf32> -> vector<16x8xf32>
    %55 = vector.extract_strided_slice %7 {offsets = [0, 16], sizes = [16, 8], strides = [1, 1]} : vector<16x96xbf16> to vector<16x8xbf16>
    %56 = vector.extract_strided_slice %7 {offsets = [0, 48], sizes = [16, 8], strides = [1, 1]} : vector<16x96xbf16> to vector<16x8xbf16>
    %57 = vector.extract_strided_slice %7 {offsets = [0, 80], sizes = [16, 8], strides = [1, 1]} : vector<16x96xbf16> to vector<16x8xbf16>
    %cst_19 = arith.constant dense<0.000000e+00> : vector<16x16xf32>
    %58 = tpu.matmul %55, %56, %cst_19 {dimension_numbers = #tpu.dot_dimension_numbers<[1], [1], [0], [0], [0, 0, 1, 0], [], []>} : vector<16x8xbf16>, vector<16x8xbf16>, vector<16x16xf32> -> vector<16x16xf32>
    %59 = arith.addf %58, %14 : vector<16x16xf32>
    %cst_20 = arith.constant dense<0xFF800000> : vector<16xf32>
    %60 = vector.multi_reduction <maximumf>, %59, %cst_20 [1] : vector<16x16xf32> to vector<16xf32>
    %61 = vector.shape_cast %60 : vector<16xf32> to vector<16x1xf32>
    %62 = vector.broadcast %61 : vector<16x1xf32> to vector<16x16xf32>
    %63 = arith.subf %59, %62 : vector<16x16xf32>
    %64 = math.exp %63 : vector<16x16xf32>
    %cst_21 = arith.constant dense<0.000000e+00> : vector<16xf32>
    %65 = vector.multi_reduction <add>, %64, %cst_21 [1] : vector<16x16xf32> to vector<16xf32>
    %66 = vector.shape_cast %65 : vector<16xf32> to vector<16x1xf32>
    %67 = tpu.reciprocal %66 {approx = true} : vector<16x1xf32> -> vector<16x1xf32>
    %68 = vector.broadcast %67 : vector<16x1xf32> to vector<16x16xf32>
    %69 = arith.mulf %64, %68 : vector<16x16xf32>
    %70 = arith.truncf %69 : vector<16x16xf32> to vector<16x16xbf16>
    %cst_22 = arith.constant dense<0.000000e+00> : vector<16x8xf32>
    %71 = tpu.matmul %70, %57, %cst_22 {dimension_numbers = #tpu.dot_dimension_numbers<[1], [0], [0], [1], [0, 0, 1, 1], [], []>} : vector<16x16xbf16>, vector<16x8xbf16>, vector<16x8xf32> -> vector<16x8xf32>
    %72 = vector.extract_strided_slice %7 {offsets = [0, 24], sizes = [16, 8], strides = [1, 1]} : vector<16x96xbf16> to vector<16x8xbf16>
    %73 = vector.extract_strided_slice %7 {offsets = [0, 56], sizes = [16, 8], strides = [1, 1]} : vector<16x96xbf16> to vector<16x8xbf16>
    %74 = vector.extract_strided_slice %7 {offsets = [0, 88], sizes = [16, 8], strides = [1, 1]} : vector<16x96xbf16> to vector<16x8xbf16>
    %cst_23 = arith.constant dense<0.000000e+00> : vector<16x16xf32>
    %75 = tpu.matmul %72, %73, %cst_23 {dimension_numbers = #tpu.dot_dimension_numbers<[1], [1], [0], [0], [0, 0, 1, 0], [], []>} : vector<16x8xbf16>, vector<16x8xbf16>, vector<16x16xf32> -> vector<16x16xf32>
    %76 = arith.addf %75, %14 : vector<16x16xf32>
    %cst_24 = arith.constant dense<0xFF800000> : vector<16xf32>
    %77 = vector.multi_reduction <maximumf>, %76, %cst_24 [1] : vector<16x16xf32> to vector<16xf32>
    %78 = vector.shape_cast %77 : vector<16xf32> to vector<16x1xf32>
    %79 = vector.broadcast %78 : vector<16x1xf32> to vector<16x16xf32>
    %80 = arith.subf %76, %79 : vector<16x16xf32>
    %81 = math.exp %80 : vector<16x16xf32>
    %cst_25 = arith.constant dense<0.000000e+00> : vector<16xf32>
    %82 = vector.multi_reduction <add>, %81, %cst_25 [1] : vector<16x16xf32> to vector<16xf32>
    %83 = vector.shape_cast %82 : vector<16xf32> to vector<16x1xf32>
    %84 = tpu.reciprocal %83 {approx = true} : vector<16x1xf32> -> vector<16x1xf32>
    %85 = vector.broadcast %84 : vector<16x1xf32> to vector<16x16xf32>
    %86 = arith.mulf %81, %85 : vector<16x16xf32>
    %87 = arith.truncf %86 : vector<16x16xf32> to vector<16x16xbf16>
    %cst_26 = arith.constant dense<0.000000e+00> : vector<16x8xf32>
    %88 = tpu.matmul %87, %74, %cst_26 {dimension_numbers = #tpu.dot_dimension_numbers<[1], [0], [0], [1], [0, 0, 1, 1], [], []>} : vector<16x16xbf16>, vector<16x8xbf16>, vector<16x8xf32> -> vector<16x8xf32>
    %89 = tpu.concatenate %37, %54, %71, %88 in 1 : vector<16x8xf32>, vector<16x8xf32>, vector<16x8xf32>, vector<16x8xf32> -> vector<16x32xf32>
    %90 = vector.broadcast %20 : vector<16x1xf32> to vector<16x32xf32>
    %91 = arith.mulf %89, %90 : vector<16x32xf32>
    %92 = arith.addf %91, %8 : vector<16x32xf32>
    %cst_27 = arith.constant 0.000000e+00 : f32
    %93 = vector.broadcast %cst_27 : f32 to vector<16x32xf32>
    %94 = arith.maximumf %92, %93 : vector<16x32xf32>
    %95 = arith.truncf %94 : vector<16x32xf32> to vector<16x32xbf16>
    %c0_28 = arith.constant 0 : index
    %c0_29 = arith.constant 0 : index
    %96 = vector.load %arg5[%c0_28, %c0_29] : memref<16x32xbf16, #tpu.memory_space<vmem>>, vector<16x32xbf16>
    tpu.vector_store %arg5[%c0_28, %c0_29], %95 {strides = array<i32>} : memref<16x32xbf16, #tpu.memory_space<vmem>>, vector<16x32xbf16>,
    return
  }
  func.func @transform_0(%arg0: i32) -> (i32, i32) {
    %c0_i32 = arith.constant 0 : i32
    %c0_i32_0 = arith.constant 0 : i32
    %c0_i32_1 = arith.constant 0 : i32
    return %c0_i32, %c0_i32_0 : i32, i32
  }
  func.func @transform_1(%arg0: i32) -> (i32, i32) {
    %c0_i32 = arith.constant 0 : i32
    %c0_i32_0 = arith.constant 0 : i32
    %c0_i32_1 = arith.constant 0 : i32
    return %c0_i32, %c0_i32_0 : i32, i32
  }
  func.func @transform_2(%arg0: i32) -> (i32, i32) {
    %c0_i32 = arith.constant 0 : i32
    %c0_i32_0 = arith.constant 0 : i32
    %c0_i32_1 = arith.constant 0 : i32
    return %c0_i32, %c0_i32_0 : i32, i32
  }
  func.func @transform_3(%arg0: i32) -> (i32, i32) {
    %c0_i32 = arith.constant 0 : i32
    %c0_i32_0 = arith.constant 0 : i32
    %c0_i32_1 = arith.constant 0 : i32
    return %c0_i32, %c0_i32_0 : i32, i32
  }
  func.func @transform_4(%arg0: i32) -> (i32, i32) {
    %c0_i32 = arith.constant 0 : i32
    %c0_i32_0 = arith.constant 0 : i32
    %c0_i32_1 = arith.constant 0 : i32
    return %c0_i32, %c0_i32_0 : i32, i32
  }
}

module attributes {stable_mosaic.version = 11 : i64} {
  func.func @_pool_heads_kernel(%arg0: i32, %arg1: memref<2x16xbf16, #tpu.memory_space<vmem>>, %arg2: memref<16x32xbf16, #tpu.memory_space<vmem>>, %arg3: memref<32x2xf32, #tpu.memory_space<vmem>>, %arg4: memref<1x2xf32, #tpu.memory_space<vmem>>, %arg5: memref<2x2xf32, #tpu.memory_space<vmem>>) attributes {dimension_semantics = [#tpu.dimension_semantics<arbitrary>], iteration_bounds = array<i64: 1>, scalar_prefetch = 0 : i64, scratch_operands = 0 : i64, tpu.core_type = #tpu.core_type<tc>, window_params = [{pipeline_mode = #tpu.pipeline_mode<synchronous>, transform_indices = @transform_0, window_bounds = array<i64: 2, 16>}, {pipeline_mode = #tpu.pipeline_mode<synchronous>, transform_indices = @transform_1, window_bounds = array<i64: 16, 32>}, {pipeline_mode = #tpu.pipeline_mode<synchronous>, transform_indices = @transform_2, window_bounds = array<i64: 32, 2>}, {pipeline_mode = #tpu.pipeline_mode<synchronous>, transform_indices = @transform_3, window_bounds = array<i64: 1, 2>}, {pipeline_mode = #tpu.pipeline_mode<synchronous>, transform_indices = @transform_4, window_bounds = array<i64: 2, 2>}]} {
    %c0 = arith.constant 0 : index
    %c0_0 = arith.constant 0 : index
    %0 = vector.load %arg1[%c0, %c0_0] : memref<2x16xbf16, #tpu.memory_space<vmem>>, vector<2x16xbf16>
    %c0_1 = arith.constant 0 : index
    %c0_2 = arith.constant 0 : index
    %1 = vector.load %arg2[%c0_1, %c0_2] : memref<16x32xbf16, #tpu.memory_space<vmem>>, vector<16x32xbf16>
    %cst = arith.constant dense<0.000000e+00> : vector<2x32xf32>
    %2 = tpu.matmul %0, %1, %cst {dimension_numbers = #tpu.dot_dimension_numbers<[1], [0], [0], [1], [0, 0, 1, 1], [], []>} : vector<2x16xbf16>, vector<16x32xbf16>, vector<2x32xf32> -> vector<2x32xf32>
    %c0_3 = arith.constant 0 : index
    %c0_4 = arith.constant 0 : index
    %3 = vector.load %arg3[%c0_3, %c0_4] : memref<32x2xf32, #tpu.memory_space<vmem>>, vector<32x2xf32>
    %cst_5 = arith.constant dense<0.000000e+00> : vector<2x2xf32>
    %4 = tpu.matmul %2, %3, %cst_5 {dimension_numbers = #tpu.dot_dimension_numbers<[1], [0], [0], [1], [0, 0, 1, 1], [], []>} : vector<2x32xf32>, vector<32x2xf32>, vector<2x2xf32> -> vector<2x2xf32>
    %c0_6 = arith.constant 0 : index
    %c0_7 = arith.constant 0 : index
    %5 = vector.load %arg4[%c0_6, %c0_7] : memref<1x2xf32, #tpu.memory_space<vmem>>, vector<1x2xf32>
    %6 = vector.broadcast %5 : vector<1x2xf32> to vector<2x2xf32>
    %7 = arith.addf %4, %6 : vector<2x2xf32>
    %c0_8 = arith.constant 0 : index
    %c0_9 = arith.constant 0 : index
    %8 = vector.load %arg5[%c0_8, %c0_9] : memref<2x2xf32, #tpu.memory_space<vmem>>, vector<2x2xf32>
    tpu.vector_store %arg5[%c0_8, %c0_9], %7 {strides = array<i32>} : memref<2x2xf32, #tpu.memory_space<vmem>>, vector<2x2xf32>,
    return
  }
  func.func @transform_0(%arg0: i32) -> (i32, i32) {
    %c0_i32 = arith.constant 0 : i32
    %c0_i32_0 = arith.constant 0 : i32
    %c0_i32_1 = arith.constant 0 : i32
    return %c0_i32, %c0_i32_0 : i32, i32
  }
  func.func @transform_1(%arg0: i32) -> (i32, i32) {
    %c0_i32 = arith.constant 0 : i32
    %c0_i32_0 = arith.constant 0 : i32
    %c0_i32_1 = arith.constant 0 : i32
    return %c0_i32, %c0_i32_0 : i32, i32
  }
  func.func @transform_2(%arg0: i32) -> (i32, i32) {
    %c0_i32 = arith.constant 0 : i32
    %c0_i32_0 = arith.constant 0 : i32
    %c0_i32_1 = arith.constant 0 : i32
    return %c0_i32, %c0_i32_0 : i32, i32
  }
  func.func @transform_3(%arg0: i32) -> (i32, i32) {
    %c0_i32 = arith.constant 0 : i32
    %c0_i32_0 = arith.constant 0 : i32
    %c0_i32_1 = arith.constant 0 : i32
    return %c0_i32, %c0_i32_0 : i32, i32
  }
  func.func @transform_4(%arg0: i32) -> (i32, i32) {
    %c0_i32 = arith.constant 0 : i32
    %c0_i32_0 = arith.constant 0 : i32
    %c0_i32_1 = arith.constant 0 : i32
    return %c0_i32, %c0_i32_0 : i32, i32
  }
}

module attributes {stable_mosaic.version = 11 : i64} {
  func.func @_conv_layer_kernel(%arg0: i32, %arg1: memref<16x8xbf16, #tpu.memory_space<vmem>>, %arg2: memref<8x128xbf16, #tpu.memory_space<vmem>>, %arg3: memref<1x128xf32, #tpu.memory_space<vmem>>, %arg4: memref<16x16xi8, #tpu.memory_space<vmem>>, %arg5: memref<16x32xbf16, #tpu.memory_space<vmem>>) attributes {dimension_semantics = [#tpu.dimension_semantics<parallel>], iteration_bounds = array<i64: 1>, scalar_prefetch = 0 : i64, scratch_operands = 0 : i64, tpu.core_type = #tpu.core_type<tc>, window_params = [{pipeline_mode = #tpu.pipeline_mode<synchronous>, transform_indices = @transform_0, window_bounds = array<i64: 16, 8>}, {pipeline_mode = #tpu.pipeline_mode<synchronous>, transform_indices = @transform_1, window_bounds = array<i64: 8, 128>}, {pipeline_mode = #tpu.pipeline_mode<synchronous>, transform_indices = @transform_2, window_bounds = array<i64: 1, 128>}, {pipeline_mode = #tpu.pipeline_mode<synchronous>, transform_indices = @transform_3, window_bounds = array<i64: 16, 16>}, {pipeline_mode = #tpu.pipeline_mode<synchronous>, transform_indices = @transform_4, window_bounds = array<i64: 16, 32>}]} {
    %c0 = arith.constant 0 : index
    %c0_0 = arith.constant 0 : index
    %0 = vector.load %arg1[%c0, %c0_0] : memref<16x8xbf16, #tpu.memory_space<vmem>>, vector<16x8xbf16>
    %c0_1 = arith.constant 0 : index
    %c0_2 = arith.constant 0 : index
    %1 = vector.load %arg2[%c0_1, %c0_2] : memref<8x128xbf16, #tpu.memory_space<vmem>>, vector<8x128xbf16>
    %cst = arith.constant dense<0.000000e+00> : vector<16x128xf32>
    %2 = tpu.matmul %0, %1, %cst {dimension_numbers = #tpu.dot_dimension_numbers<[1], [0], [0], [1], [0, 0, 1, 1], [], []>} : vector<16x8xbf16>, vector<8x128xbf16>, vector<16x128xf32> -> vector<16x128xf32>
    %c0_3 = arith.constant 0 : index
    %c0_4 = arith.constant 0 : index
    %3 = vector.load %arg3[%c0_3, %c0_4] : memref<1x128xf32, #tpu.memory_space<vmem>>, vector<1x128xf32>
    %4 = vector.broadcast %3 : vector<1x128xf32> to vector<16x128xf32>
    %5 = arith.addf %2, %4 : vector<16x128xf32>
    %6 = vector.extract_strided_slice %5 {offsets = [0, 0], sizes = [16, 96], strides = [1, 1]} : vector<16x128xf32> to vector<16x96xf32>
    %7 = arith.truncf %6 : vector<16x96xf32> to vector<16x96xbf16>
    %8 = vector.extract_strided_slice %5 {offsets = [0, 96], sizes = [16, 32], strides = [1, 1]} : vector<16x128xf32> to vector<16x32xf32>
    %c0_5 = arith.constant 0 : index
    %c0_6 = arith.constant 0 : index
    %9 = vector.load %arg4[%c0_5, %c0_6] : memref<16x16xi8, #tpu.memory_space<vmem>>, vector<16x16xi8>
    %10 = arith.sitofp %9 : vector<16x16xi8> to vector<16x16xf32>
    %cst_7 = arith.constant 1.000000e+00 : f32
    %11 = vector.broadcast %cst_7 : f32 to vector<16x16xf32>
    %12 = arith.subf %10, %11 : vector<16x16xf32>
    %cst_8 = arith.constant 1.000000e+30 : f32
    %13 = vector.broadcast %cst_8 : f32 to vector<16x16xf32>
    %14 = arith.mulf %12, %13 : vector<16x16xf32>
    %cst_9 = arith.constant dense<0.000000e+00> : vector<16xf32>
    %15 = vector.multi_reduction <add>, %10, %cst_9 [1] : vector<16x16xf32> to vector<16xf32>
    %16 = vector.shape_cast %15 : vector<16xf32> to vector<16x1xf32>
    %cst_10 = arith.constant 0.000000e+00 : f32
    %17 = vector.broadcast %cst_10 : f32 to vector<16x1xf32>
    %18 = arith.cmpf ogt, %16, %17 : vector<16x1xf32>
    %19 = arith.extui %18 : vector<16x1xi1> to vector<16x1xi32>
    %20 = arith.sitofp %19 : vector<16x1xi32> to vector<16x1xf32>
    %21 = vector.extract_strided_slice %7 {offsets = [0, 0], sizes = [16, 8], strides = [1, 1]} : vector<16x96xbf16> to vector<16x8xbf16>
    %22 = vector.extract_strided_slice %7 {offsets = [0, 32], sizes = [16, 8], strides = [1, 1]} : vector<16x96xbf16> to vector<16x8xbf16>
    %23 = vector.extract_strided_slice %7 {offsets = [0, 64], sizes = [16, 8], strides = [1, 1]} : vector<16x96xbf16> to vector<16x8xbf16>
    %cst_11 = arith.constant dense<0.000000e+00> : vector<16x16xf32>
    %24 = tpu.matmul %21, %22, %cst_11 {dimension_numbers = #tpu.dot_dimension_numbers<[1], [1], [0], [0], [0, 0, 1, 0], [], []>} : vector<16x8xbf16>, vector<16x8xbf16>, vector<16x16xf32> -> vector<16x16xf32>
    %25 = arith.addf %24, %14 : vector<16x16xf32>
    %cst_12 = arith.constant dense<0xFF800000> : vector<16xf32>
    %26 = vector.multi_reduction <maximumf>, %25, %cst_12 [1] : vector<16x16xf32> to vector<16xf32>
    %27 = vector.shape_cast %26 : vector<16xf32> to vector<16x1xf32>
    %28 = vector.broadcast %27 : vector<16x1xf32> to vector<16x16xf32>
    %29 = arith.subf %25, %28 : vector<16x16xf32>
    %30 = math.exp %29 : vector<16x16xf32>
    %cst_13 = arith.constant dense<0.000000e+00> : vector<16xf32>
    %31 = vector.multi_reduction <add>, %30, %cst_13 [1] : vector<16x16xf32> to vector<16xf32>
    %32 = vector.shape_cast %31 : vector<16xf32> to vector<16x1xf32>
    %33 = tpu.reciprocal %32 {approx = true} : vector<16x1xf32> -> vector<16x1xf32>
    %34 = vector.broadcast %33 : vector<16x1xf32> to vector<16x16xf32>
    %35 = arith.mulf %30, %34 : vector<16x16xf32>
    %36 = arith.truncf %35 : vector<16x16xf32> to vector<16x16xbf16>
    %cst_14 = arith.constant dense<0.000000e+00> : vector<16x8xf32>
    %37 = tpu.matmul %36, %23, %cst_14 {dimension_numbers = #tpu.dot_dimension_numbers<[1], [0], [0], [1], [0, 0, 1, 1], [], []>} : vector<16x16xbf16>, vector<16x8xbf16>, vector<16x8xf32> -> vector<16x8xf32>
    %38 = vector.extract_strided_slice %7 {offsets = [0, 8], sizes = [16, 8], strides = [1, 1]} : vector<16x96xbf16> to vector<16x8xbf16>
    %39 = vector.extract_strided_slice %7 {offsets = [0, 40], sizes = [16, 8], strides = [1, 1]} : vector<16x96xbf16> to vector<16x8xbf16>
    %40 = vector.extract_strided_slice %7 {offsets = [0, 72], sizes = [16, 8], strides = [1, 1]} : vector<16x96xbf16> to vector<16x8xbf16>
    %cst_15 = arith.constant dense<0.000000e+00> : vector<16x16xf32>
    %41 = tpu.matmul %38, %39, %cst_15 {dimension_numbers = #tpu.dot_dimension_numbers<[1], [1], [0], [0], [0, 0, 1, 0], [], []>} : vector<16x8xbf16>, vector<16x8xbf16>, vector<16x16xf32> -> vector<16x16xf32>
    %42 = arith.addf %41, %14 : vector<16x16xf32>
    %cst_16 = arith.constant dense<0xFF800000> : vector<16xf32>
    %43 = vector.multi_reduction <maximumf>, %42, %cst_16 [1] : vector<16x16xf32> to vector<16xf32>
    %44 = vector.shape_cast %43 : vector<16xf32> to vector<16x1xf32>
    %45 = vector.broadcast %44 : vector<16x1xf32> to vector<16x16xf32>
    %46 = arith.subf %42, %45 : vector<16x16xf32>
    %47 = math.exp %46 : vector<16x16xf32>
    %cst_17 = arith.constant dense<0.000000e+00> : vector<16xf32>
    %48 = vector.multi_reduction <add>, %47, %cst_17 [1] : vector<16x16xf32> to vector<16xf32>
    %49 = vector.shape_cast %48 : vector<16xf32> to vector<16x1xf32>
    %50 = tpu.reciprocal %49 {approx = true} : vector<16x1xf32> -> vector<16x1xf32>
    %51 = vector.broadcast %50 : vector<16x1xf32> to vector<16x16xf32>
    %52 = arith.mulf %47, %51 : vector<16x16xf32>
    %53 = arith.truncf %52 : vector<16x16xf32> to vector<16x16xbf16>
    %cst_18 = arith.constant dense<0.000000e+00> : vector<16x8xf32>
    %54 = tpu.matmul %53, %40, %cst_18 {dimension_numbers = #tpu.dot_dimension_numbers<[1], [0], [0], [1], [0, 0, 1, 1], [], []>} : vector<16x16xbf16>, vector<16x8xbf16>, vector<16x8xf32> -> vector<16x8xf32>
    %55 = vector.extract_strided_slice %7 {offsets = [0, 16], sizes = [16, 8], strides = [1, 1]} : vector<16x96xbf16> to vector<16x8xbf16>
    %56 = vector.extract_strided_slice %7 {offsets = [0, 48], sizes = [16, 8], strides = [1, 1]} : vector<16x96xbf16> to vector<16x8xbf16>
    %57 = vector.extract_strided_slice %7 {offsets = [0, 80], sizes = [16, 8], strides = [1, 1]} : vector<16x96xbf16> to vector<16x8xbf16>
    %cst_19 = arith.constant dense<0.000000e+00> : vector<16x16xf32>
    %58 = tpu.matmul %55, %56, %cst_19 {dimension_numbers = #tpu.dot_dimension_numbers<[1], [1], [0], [0], [0, 0, 1, 0], [], []>} : vector<16x8xbf16>, vector<16x8xbf16>, vector<16x16xf32> -> vector<16x16xf32>
    %59 = arith.addf %58, %14 : vector<16x16xf32>
    %cst_20 = arith.constant dense<0xFF800000> : vector<16xf32>
    %60 = vector.multi_reduction <maximumf>, %59, %cst_20 [1] : vector<16x16xf32> to vector<16xf32>
    %61 = vector.shape_cast %60 : vector<16xf32> to vector<16x1xf32>
    %62 = vector.broadcast %61 : vector<16x1xf32> to vector<16x16xf32>
    %63 = arith.subf %59, %62 : vector<16x16xf32>
    %64 = math.exp %63 : vector<16x16xf32>
    %cst_21 = arith.constant dense<0.000000e+00> : vector<16xf32>
    %65 = vector.multi_reduction <add>, %64, %cst_21 [1] : vector<16x16xf32> to vector<16xf32>
    %66 = vector.shape_cast %65 : vector<16xf32> to vector<16x1xf32>
    %67 = tpu.reciprocal %66 {approx = true} : vector<16x1xf32> -> vector<16x1xf32>
    %68 = vector.broadcast %67 : vector<16x1xf32> to vector<16x16xf32>
    %69 = arith.mulf %64, %68 : vector<16x16xf32>
    %70 = arith.truncf %69 : vector<16x16xf32> to vector<16x16xbf16>
    %cst_22 = arith.constant dense<0.000000e+00> : vector<16x8xf32>
    %71 = tpu.matmul %70, %57, %cst_22 {dimension_numbers = #tpu.dot_dimension_numbers<[1], [0], [0], [1], [0, 0, 1, 1], [], []>} : vector<16x16xbf16>, vector<16x8xbf16>, vector<16x8xf32> -> vector<16x8xf32>
    %72 = vector.extract_strided_slice %7 {offsets = [0, 24], sizes = [16, 8], strides = [1, 1]} : vector<16x96xbf16> to vector<16x8xbf16>
    %73 = vector.extract_strided_slice %7 {offsets = [0, 56], sizes = [16, 8], strides = [1, 1]} : vector<16x96xbf16> to vector<16x8xbf16>
    %74 = vector.extract_strided_slice %7 {offsets = [0, 88], sizes = [16, 8], strides = [1, 1]} : vector<16x96xbf16> to vector<16x8xbf16>
    %cst_23 = arith.constant dense<0.000000e+00> : vector<16x16xf32>
    %75 = tpu.matmul %72, %73, %cst_23 {dimension_numbers = #tpu.dot_dimension_numbers<[1], [1], [0], [0], [0, 0, 1, 0], [], []>} : vector<16x8xbf16>, vector<16x8xbf16>, vector<16x16xf32> -> vector<16x16xf32>
    %76 = arith.addf %75, %14 : vector<16x16xf32>
    %cst_24 = arith.constant dense<0xFF800000> : vector<16xf32>
    %77 = vector.multi_reduction <maximumf>, %76, %cst_24 [1] : vector<16x16xf32> to vector<16xf32>
    %78 = vector.shape_cast %77 : vector<16xf32> to vector<16x1xf32>
    %79 = vector.broadcast %78 : vector<16x1xf32> to vector<16x16xf32>
    %80 = arith.subf %76, %79 : vector<16x16xf32>
    %81 = math.exp %80 : vector<16x16xf32>
    %cst_25 = arith.constant dense<0.000000e+00> : vector<16xf32>
    %82 = vector.multi_reduction <add>, %81, %cst_25 [1] : vector<16x16xf32> to vector<16xf32>
    %83 = vector.shape_cast %82 : vector<16xf32> to vector<16x1xf32>
    %84 = tpu.reciprocal %83 {approx = true} : vector<16x1xf32> -> vector<16x1xf32>
    %85 = vector.broadcast %84 : vector<16x1xf32> to vector<16x16xf32>
    %86 = arith.mulf %81, %85 : vector<16x16xf32>
    %87 = arith.truncf %86 : vector<16x16xf32> to vector<16x16xbf16>
    %cst_26 = arith.constant dense<0.000000e+00> : vector<16x8xf32>
    %88 = tpu.matmul %87, %74, %cst_26 {dimension_numbers = #tpu.dot_dimension_numbers<[1], [0], [0], [1], [0, 0, 1, 1], [], []>} : vector<16x16xbf16>, vector<16x8xbf16>, vector<16x8xf32> -> vector<16x8xf32>
    %89 = tpu.concatenate %37, %54, %71, %88 in 1 : vector<16x8xf32>, vector<16x8xf32>, vector<16x8xf32>, vector<16x8xf32> -> vector<16x32xf32>
    %90 = vector.broadcast %20 : vector<16x1xf32> to vector<16x32xf32>
    %91 = arith.mulf %89, %90 : vector<16x32xf32>
    %92 = arith.addf %91, %8 : vector<16x32xf32>
    %cst_27 = arith.constant 0.000000e+00 : f32
    %93 = vector.broadcast %cst_27 : f32 to vector<16x32xf32>
    %94 = arith.maximumf %92, %93 : vector<16x32xf32>
    %95 = arith.truncf %94 : vector<16x32xf32> to vector<16x32xbf16>
    %c0_28 = arith.constant 0 : index
    %c0_29 = arith.constant 0 : index
    %96 = vector.load %arg5[%c0_28, %c0_29] : memref<16x32xbf16, #tpu.memory_space<vmem>>, vector<16x32xbf16>
    tpu.vector_store %arg5[%c0_28, %c0_29], %95 {strides = array<i32>} : memref<16x32xbf16, #tpu.memory_space<vmem>>, vector<16x32xbf16>,
    return
  }
  func.func @transform_0(%arg0: i32) -> (i32, i32) {
    %c0_i32 = arith.constant 0 : i32
    %c0_i32_0 = arith.constant 0 : i32
    %c0_i32_1 = arith.constant 0 : i32
    return %c0_i32, %c0_i32_0 : i32, i32
  }
  func.func @transform_1(%arg0: i32) -> (i32, i32) {
    %c0_i32 = arith.constant 0 : i32
    %c0_i32_0 = arith.constant 0 : i32
    %c0_i32_1 = arith.constant 0 : i32
    return %c0_i32, %c0_i32_0 : i32, i32
  }
  func.func @transform_2(%arg0: i32) -> (i32, i32) {
    %c0_i32 = arith.constant 0 : i32
    %c0_i32_0 = arith.constant 0 : i32
    %c0_i32_1 = arith.constant 0 : i32
    return %c0_i32, %c0_i32_0 : i32, i32
  }
  func.func @transform_3(%arg0: i32) -> (i32, i32) {
    %c0_i32 = arith.constant 0 : i32
    %c0_i32_0 = arith.constant 0 : i32
    %c0_i32_1 = arith.constant 0 : i32
    return %c0_i32, %c0_i32_0 : i32, i32
  }
  func.func @transform_4(%arg0: i32) -> (i32, i32) {
    %c0_i32 = arith.constant 0 : i32
    %c0_i32_0 = arith.constant 0 : i32
    %c0_i32_1 = arith.constant 0 : i32
    return %c0_i32, %c0_i32_0 : i32, i32
  }
}

</mosaic_0001>

<bundles_post_ra>
// kernel: graph_transformer_forward.5
= control target key start
LH: loop header
LB: loop body
LE: loop exit
PB: predicated region body
PF: predicated region fallthrough
CT: control target
= control target key end

     0   :  { %v200_v0 = vmov 0.0   ;;  %vm201_vm0 = vmmov 0   ;;  %v202_v2 = vmov 0.0|0.0   ;;  %vm27_vm1 = vcmask 130048   ;;  %s252_s1 = inlined_call_operand.vmem [shape: bf16[16,32], index: 1, kind: input, shape index: {}]   ;;  %s253_s0 = inlined_call_operand.vmem [shape: bf16[2,16], index: 0, kind: input, shape index: {}]   ;;  %s254_s2 = inlined_call_operand.vmem [shape: f32[32,2], index: 2, kind: input, shape index: {}]   ;;  %s255_s3 = inlined_call_operand.vmem [shape: f32[1,2], index: 3, kind: input, shape index: {}]   ;;  %s256_s4 = inlined_call_operand.vmem [shape: f32[2,2], index: 4, kind: output, shape index: {}]  }
   0x1   :  { %173 = vmatprep.subr.bf16.mxu0 %v200_v0  ;;  %v199_v1 = vld [vmem:[%s252_s1] sm:$0xff]   ;;  %175 = vmatprep.mubr.msk.bf16.mxu0 %vm201_vm0, %v200_v0  ;;  %v72_v4 = vld [vmem:[%s254_s2 + $0x8] sm:$0xff]  ;;  %v73_v7 = vld [vmem:[%s254_s2 + $0x10] sm:$0xff]  ;;  %vm82_vm2 = vcmask 261120   ;;  %vm156_vm3 = vcmask 9216  }
   0x2   :  { %190 = vmatprep.subr.bf16.mxu1 %v202_v2  ;;  %v71_v3 = vld [vmem:[%s254_s2] sm:$0xff]  ;;  %187 = vmatprep.mubr.msk.f32.mxu1 %vm201_vm0, %v200_v0  ;;  %v74_v8 = vld [vmem:[%s254_s2 + $0x18] sm:$0xff] }
   0x3   :  { %174 = vmatpush3.bf16.msra.mxu0 %v199_v1  ;;  %v18_v5 = vld [vmem:[%s253_s0] sm:$0x1]  ;;  %v191_v6 = vpack.c.bf16 %v72_v4, %v71_v3  ;;  %v194_v9 = vpack.c.bf16 %v74_v8, %v73_v7 }
   0x4   :  { %v164_v14 = vld [vmem:[%s255_s3] ss:$0 sm:$0xff] }
   0x5   :  { %192 = vmatpush3.bf16.msra.mxu1 %v191_v6 }
   0x6   :  { %176 = vmatmul.mubr.msk.bf16.vlgmr.msra.gmra.mrb[0].mxu0 %vm27_vm1, %v18_v5  ;;  %193 = vmatprep.subr.bf16.mxu1 %v202_v2 }
   0x9   :  { %195 = vmatpush3.bf16.msra.mxu1 %v194_v9 }
  0xd9   :  { %v65_v10 = vpop.f32.mrb[0].mxu0 }
  0xda   :  { %v177_v11 = vpop.f32.mrb[1].mxu0  ;;  %188 = vmatmul.mubr.msk.f32.vlgmr.msra.gmra.mrb[0].mxu1 %vm82_vm2, %v65_v10 }
  0xdb   :  { %v68_v12 = vpop.f32.mrb[2].mxu0 }
  0xdc   :  { %v178_v13 = vpop.f32.mrb[3].mxu0 }
 0x1ad   :  { %v152_v15 = vpop.f32.mrb[0].mxu1 }
 0x1ae   :  { %v153_v16 = vadd.f32 %v164_v14, %v152_v15  ;;  %v189_v17 = vpop.f32.mrb[1].mxu1 }
 0x1b0   :  { %157 = vst.msk [vmem:[%s256_s4] sm:$0x3] %vm156_vm3, %v153_v16 }

// kernel: graph_transformer_forward.4
= control target key start
LH: loop header
LB: loop body
LE: loop exit
PB: predicated region body
PF: predicated region fallthrough
CT: control target
= control target key end

     0   :  { %v813_v0 = vmov 0.0   ;;  %vm814_vm0 = vmmov 0   ;;  %vm48_vm1 = vcmask 261120   ;;  %s817_s23 = smov 80   ;;  %s819_s24 = smov 72   ;;  %vm120_vm2 = vcmask 64512   ;;  %s978_s1 = inlined_call_operand.vmem [shape: bf16[32,128], index: 1, kind: input, shape index: {}]   ;;  %s979_s0 = inlined_call_operand.vmem [shape: bf16[16,32], index: 0, kind: input, shape index: {}]   ;;  %s980_s2 = inlined_call_operand.vmem [shape: f32[1,128], index: 2, kind: input, shape index: {}]   ;;  %s981_s3 = inlined_call_operand.vmem [shape: s8[16,16], index: 3, kind: input, shape index: {}]   ;;  %s982_s4 = inlined_call_operand.vmem [shape: bf16[16,32], index: 4, kind: output, shape index: {}]  }
   0x1   :  { %705 = vmatprep.subr.bf16.mxu0 %v813_v0  ;;  %v778_v1 = vld [vmem:[%s978_s1] sm:$0xff]   ;;  %709 = vmatprep.mubr.msk.bf16.mxu0 %vm814_vm0, %v813_v0  ;;  %v779_v2 = vld [vmem:[%s978_s1 + $0x8] sm:$0xff]   ;;  %s816_s1 = smov 96   ;;  %s820_s25 = smov 112   ;;  %vm104_vm3 = vcmask 130048   ;;  %vm629_vm5 = vcmask 195584  }
   0x2   :  { %713 = vmatprep.subr.bf16.mxu1 %v813_v0  ;;  %715 = vmatprep.mubr.msk.bf16.mxu1 %vm814_vm0, %v813_v0  ;;  %v780_v3 = vld [vmem:[%s979_s0] sm:$0xff]   ;;  %s815_s0 = smov 120   ;;  %s821_s26 = smov 104   ;;  %vm654_vm7 = vcmask 257024  }
   0x3   :  { %706 = vmatpush3.bf16.msra.mxu0 %v778_v1  ;;  %v661_v4 = vld [vmem:[%s980_s2] ss:$0 sm:$0xff]  ;;  %s818_s2 = smov 88   ;;  %s823_s29 = smov 64  }
   0x4   :  { %707 = vmatprep.subr.bf16.mxu0 %v813_v0  ;;  %v683_v23 = vld [vmem:[%s981_s3] sm:$0xf]   ;;  %s822_s3 = smov 56   ;;  %s824_s30 = smov 48  }
   0x5   :  { %v684_v24 = vunpack.c.0.s8 %v683_v23  ;;  %v685_v25 = vunpack.c.1.s8 %v683_v23  ;;  %s825_s5 = smov 40   ;;  %s826_s6 = smov 8  }
   0x6   :  { %s827_s7 = smov 16   ;;  %s828_s8 = smov 24  }
   0x7   :  { %708 = vmatpush3.bf16.msra.mxu0 %v779_v2  ;;  %v913_v26 = vcvt.s32.f32 %v684_v24  ;;  %v915_v27 = vcvt.s32.f32 %v685_v25  ;;  %s829_s9 = smov 32  }
   0x8   :  { %719 = vmatprep.subr.bf16.mxu0 %v813_v0 }
   0x9   :  { %v666_v28 = vadd.f32 -1.0, %v913_v26  ;;  %v667_v29 = vadd.f32 -1.0, %v915_v27 }
   0xa   :  { %710 = vmatmul.mubr.msk.bf16.vlgmr.msra.gmra.mrb[0].mxu0 %vm48_vm1, %v780_v3 }
   0xb   :  { %721 = vmatprep.mubr.msk.bf16.mxu0 %vm814_vm0, %v813_v0  ;;  %v102_v30 = vmul.f32 1e+30, %v666_v28  ;;  %v103_v31 = vmul.f32 1e+30, %v667_v29 }
  0xdd   :  { %v86_v5 = vpop.f32.mrb[0].mxu0 }
  0xde   :  { %v711_v6 = vpop.f32.mrb[1].mxu0  ;;  %v877_v8 = vadd.f32 %v661_v4, %v86_v5 }
  0xdf   :  { %v89_v7 = vpop.f32.mrb[2].mxu0 }
  0xe0   :  { %v879_v9 = vadd.f32 %v661_v4, %v89_v7  ;;  %v712_v10 = vpop.f32.mrb[3].mxu0 }
  0xe2   :  { %v883_v11 = vpack.c.bf16 %v879_v9, %v877_v8 }
  0xe4   :  { %238 = vrot.lane.b32.xlu1 %v883_v11, %s815_s0  ;;  %118 = vrot.lane.b32.xlu0 %v883_v11, %s816_s1 }
  0xe8   :  { %361 = vrot.lane.b32.xlu1 %v883_v11, %s817_s23  ;;  %240 = vrot.lane.b32.xlu0 %v883_v11, %s818_s2 }
  0xec   :  { %482 = vrot.lane.b32.xlu1 %v883_v11, %s819_s24  ;;  %359 = vrot.lane.b32.xlu0 %v883_v11, %s820_s25 }
  0xf0   :  { %480 = vrot.lane.b32.xlu0 %v883_v11, %s821_s26 }
 0x156   :  { %v119_v12 = vpop.permute.xlu0 %118  ;;  %v239_v15 = vpop.permute.xlu1 %238 }
 0x157   :  { %v125_v13 = vsel %vm120_vm2, %v119_v12, 0 }
 0x158   :  { %714 = vmatpush3.bf16.xpose.msra.mxu1 %v125_v13 }
 0x159   :  { %725 = vmatprep.subr.bf16.mxu1 %v813_v0 }
 0x15a   :  { %v241_v14 = vpop.permute.xlu0 %240  ;;  %v362_v17 = vpop.permute.xlu1 %361 }
 0x15b   :  { %v246_v16 = vsel %vm120_vm2, %v241_v14, 0  ;;  %v367_v18 = vsel %vm120_vm2, %v362_v17, 0 }
 0x15e   :  { %v483_v19 = vpop.permute.xlu1 %482  ;;  %v360_v20 = vpop.permute.xlu0 %359 }
 0x15f   :  { %716 = vmatmul.mubr.msk.bf16.vlgmr.msra.gmra.mrb[0].mxu1 %vm120_vm2, %v883_v11  ;;  %v488_v21 = vsel %vm120_vm2, %v483_v19, 0 }
 0x160   :  { %726 = vmatpush3.bf16.xpose.msra.mxu1 %v246_v16  ;;  %727 = vmatprep.mubr.msk.bf16.mxu1 %vm814_vm0, %v813_v0 }
 0x161   :  { %737 = vmatprep.subr.bf16.mxu1 %v813_v0 }
 0x162   :  { %v481_v22 = vpop.permute.xlu0 %480 }
 0x167   :  { %728 = vmatmul.mubr.msk.bf16.vlgmr.msra.gmra.mrb[4].mxu1 %vm120_vm2, %v239_v15 }
 0x168   :  { %738 = vmatpush3.bf16.xpose.msra.mxu1 %v367_v18  ;;  %739 = vmatprep.mubr.msk.bf16.mxu1 %vm814_vm0, %v813_v0 }
 0x169   :  { %749 = vmatprep.subr.bf16.mxu1 %v813_v0 }
 0x16f   :  { %740 = vmatmul.mubr.msk.bf16.vlgmr.msra.gmra.mrb[8].mxu1 %vm120_vm2, %v360_v20 }
 0x170   :  { %750 = vmatpush3.bf16.xpose.msra.mxu1 %v488_v21  ;;  %751 = vmatprep.mubr.msk.bf16.mxu1 %vm814_vm0, %v813_v0 }
 0x177   :  { %752 = vmatmul.mubr.msk.bf16.vlgmr.msra.gmra.mrb[12].mxu1 %vm120_vm2, %v481_v22 }
 0x232   :  { %v161_v32 = vpop.f32.mrb[0].mxu1 }
 0x233   :  { %v162_v33 = vadd.f32 %v161_v32, %v102_v30  ;;  %v717_v34 = vpop.f32.mrb[1].mxu1 }
 0x234   :  { %v164_v35 = vpop.f32.mrb[2].mxu1 }
 0x235   :  { %v165_v36 = vadd.f32 %v164_v35, %v103_v31  ;;  %v718_v37 = vpop.f32.mrb[3].mxu1  ;;  %v168_v38 = vsel %vm104_vm3, %v162_v33, -inf }
 0x236   :  { %169 = vmax.xlane.f32.xlu1 %v168_v38 }
 0x237   :  { %v171_v39 = vsel %vm104_vm3, %v165_v36, -inf }
 0x238   :  { %172 = vmax.xlane.f32.xlu0 %v171_v39 }
 0x23a   :  { %v282_v40 = vpop.f32.mrb[4].mxu1 }
 0x23b   :  { %v283_v41 = vadd.f32 %v282_v40, %v102_v30  ;;  %v729_v42 = vpop.f32.mrb[5].mxu1 }
 0x23c   :  { %v285_v43 = vpop.f32.mrb[6].mxu1 }
 0x23d   :  { %v286_v44 = vadd.f32 %v285_v43, %v103_v31  ;;  %v730_v45 = vpop.f32.mrb[7].mxu1  ;;  %v289_v46 = vsel %vm104_vm3, %v283_v41, -inf }
 0x23e   :  { %290 = vmax.xlane.f32.xlu0 %v289_v46 }
 0x23f   :  { %v292_v47 = vsel %vm104_vm3, %v286_v44, -inf }
 0x240   :  { %293 = vmax.xlane.f32.xlu1 %v292_v47 }
 0x242   :  { %v403_v48 = vpop.f32.mrb[8].mxu1 }
 0x243   :  { %v404_v49 = vadd.f32 %v403_v48, %v102_v30  ;;  %v741_v50 = vpop.f32.mrb[9].mxu1 }
 0x244   :  { %v406_v51 = vpop.f32.mrb[10].mxu1 }
 0x245   :  { %v407_v52 = vadd.f32 %v406_v51, %v103_v31  ;;  %v742_v53 = vpop.f32.mrb[11].mxu1  ;;  %v410_v54 = vsel %vm104_vm3, %v404_v49, -inf }
 0x246   :  { %411 = vmax.xlane.f32.xlu0 %v410_v54 }
 0x247   :  { %v413_v55 = vsel %vm104_vm3, %v407_v52, -inf }
 0x248   :  { %414 = vmax.xlane.f32.xlu1 %v413_v55 }
 0x24a   :  { %v524_v56 = vpop.f32.mrb[12].mxu1 }
 0x24b   :  { %v525_v57 = vadd.f32 %v524_v56, %v102_v30  ;;  %v753_v58 = vpop.f32.mrb[13].mxu1 }
 0x24c   :  { %v527_v59 = vpop.f32.mrb[14].mxu1 }
 0x24d   :  { %v528_v60 = vadd.f32 %v527_v59, %v103_v31  ;;  %v754_v61 = vpop.f32.mrb[15].mxu1  ;;  %v531_v62 = vsel %vm104_vm3, %v525_v57, -inf }
 0x24e   :  { %532 = vmax.xlane.f32.xlu0 %v531_v62 }
 0x24f   :  { %v534_v63 = vsel %vm104_vm3, %v528_v60, -inf }
 0x250   :  { %535 = vmax.xlane.f32.xlu1 %v534_v63 }
 0x2c3   :  { %v170_v1 = vpop.xlane.xlu1 %169 }
 0x2c4   :  { %v174_v2 = vsub.f32 %v162_v33, %v170_v1 }
 0x2c5   :  { %v173_v3 = vpop.xlane.xlu0 %172 }
 0x2c6   :  { %v176_v4 = vmul.f32 1.442695, %v174_v2  ;;  %v175_v5 = vsub.f32 %v165_v36, %v173_v3 }
 0x2c8   :  { %781 = vpow2.f32 %v176_v4  ;;  %v178_v6 = vmul.f32 1.442695, %v175_v5 }
 0x2ca   :  { %783 = vpow2.f32 %v178_v6 }
 0x2cb   :  { %v291_v7 = vpop.xlane.xlu0 %290 }
 0x2cc   :  { %v295_v10 = vsub.f32 %v283_v41, %v291_v7 }
 0x2cd   :  { %v294_v19 = vpop.xlane.xlu1 %293 }
 0x2ce   :  { %v297_v12 = vmul.f32 1.442695, %v295_v10  ;;  %v296_v20 = vsub.f32 %v286_v44, %v294_v19 }
 0x2d0   :  { %785 = vpow2.f32 %v297_v12  ;;  %v299_v23 = vmul.f32 1.442695, %v296_v20 }
 0x2d2   :  { %v782_v13 = vpop.eup %781  ;;  %787 = vpow2.f32 %v299_v23 }
 0x2d3   :  { %v180_v14 = vsel %vm104_vm3, %v782_v13, 0.0  ;;  %v412_v22 = vpop.xlane.xlu0 %411 }
 0x2d4   :  { %v784_v15 = vpop.eup %783  ;;  %181 = vadd.xlane.f32.xlu0 %v180_v14  ;;  %v416_v28 = vsub.f32 %v404_v49, %v412_v22 }
 0x2d5   :  { %v183_v16 = vsel %vm104_vm3, %v784_v15, 0.0  ;;  %v415_v21 = vpop.xlane.xlu1 %414 }
 0x2d6   :  { %184 = vadd.xlane.f32.xlu1 %v183_v16  ;;  %v417_v24 = vsub.f32 %v407_v52, %v415_v21  ;;  %v418_v32 = vmul.f32 1.442695, %v416_v28 }
 0x2d8   :  { %v420_v30 = vmul.f32 1.442695, %v417_v24 }
 0x2da   :  { %v929_v17 = vpop.eup %785  ;;  %789 = vpow2.f32 %v420_v30 }
 0x2db   :  { %v301_v18 = vsel %vm104_vm3, %v929_v17, 0.0  ;;  %v533_v29 = vpop.xlane.xlu0 %532  ;;  %791 = vpow2.f32 %v418_v32 }
 0x2dc   :  { %302 = vadd.xlane.f32.xlu0 %v301_v18  ;;  %v537_v33 = vsub.f32 %v525_v57, %v533_v29  ;;  %v788_v36 = vpop.eup %787  ;;  %v105_v18 = vsel %vm104_vm3, %v913_v26, 0.0 }
 0x2dd   :  { %v536_v25 = vpop.xlane.xlu1 %535  ;;  %v304_v37 = vsel %vm104_vm3, %v788_v36, 0.0 }
 0x2de   :  { %v538_v31 = vsub.f32 %v528_v60, %v536_v25  ;;  %v539_v35 = vmul.f32 1.442695, %v537_v33 }
 0x2e0   :  { %v541_v34 = vmul.f32 1.442695, %v538_v31 }
 0x2e2   :  { %793 = vpow2.f32 %v541_v34 }
 0x2e3   :  { %795 = vpow2.f32 %v539_v35 }
 0x2e4   :  { %v790_v38 = vpop.eup %789 }
 0x2e5   :  { %v792_v39 = vpop.eup %791  ;;  %v425_v40 = vsel %vm104_vm3, %v790_v38, 0.0 }
 0x2e6   :  { %v422_v42 = vsel %vm104_vm3, %v792_v39, 0.0 }
 0x2e7   :  { %312 = vrot.lane.b32.xlu1 %v883_v11, %s822_s3 }
 0x2ec   :  { %v937_v41 = vpop.eup %793 }
 0x2ed   :  { %v796_v43 = vpop.eup %795  ;;  %v546_v44 = vsel %vm104_vm3, %v937_v41, 0.0 }
 0x2ee   :  { %v543_v45 = vsel %vm104_vm3, %v796_v43, 0.0 }
 0x2f2   :  { %191 = vrot.lane.b32.xlu0 %v883_v11, %s823_s29 }
 0x30b   :  { %305 = vadd.xlane.f32.xlu1 %v304_v37 }
 0x30f   :  { %426 = vadd.xlane.f32.xlu1 %v425_v40 }
 0x311   :  { %423 = vadd.xlane.f32.xlu0 %v422_v42 }
 0x313   :  { %547 = vadd.xlane.f32.xlu1 %v546_v44 }
 0x315   :  { %544 = vadd.xlane.f32.xlu0 %v543_v45 }
 0x324   :  { %433 = vrot.lane.b32.xlu1 %v883_v11, %s824_s30 }
 0x32b   :  { %554 = vrot.lane.b32.xlu0 %v883_v11, %s825_s5 }
 0x348   :  { %106 = vadd.xlane.f32.xlu1 %v105_v18 }
 0x361   :  { %v182_v46 = vpop.xlane.xlu0 %181 }
 0x362   :  { %797 = vrcp.f32 %v182_v46 }
 0x363   :  { %v185_v47 = vpop.xlane.xlu1 %184 }
 0x364   :  { %799 = vrcp.f32 %v185_v47 }
 0x367   :  { %v313_v55 = vpop.permute.xlu1 %312 }
 0x369   :  { %v303_v48 = vpop.xlane.xlu0 %302 }
 0x36a   :  { %801 = vrcp.f32 %v303_v48 }
 0x36c   :  { %v798_v49 = vpop.eup %797 }
 0x36d   :  { %v192_v50 = vpop.permute.xlu0 %191  ;;  %v188_v52 = vmul.f32 %v798_v49, %v782_v13 }
 0x36e   :  { %v800_v51 = vpop.eup %799  ;;  %720 = vmatpush3.bf16.msra.mxu0 %v192_v50 }
 0x36f   :  { %v189_v53 = vmul.f32 %v800_v51, %v784_v15  ;;  %731 = vmatprep.subr.bf16.mxu0 %v813_v0 }
 0x371   :  { %v190_v54 = vpack.c.bf16 %v189_v53, %v188_v52 }
 0x373   :  { %722 = vmatmul.mubr.msk.bf16.vlgmr.msra.gmra.mrb[4].mxu0 %vm104_vm3, %v190_v54 }
 0x374   :  { %732 = vmatpush3.bf16.msra.mxu0 %v313_v55  ;;  %733 = vmatprep.mubr.msk.bf16.mxu0 %vm814_vm0, %v813_v0  ;;  %v802_v58 = vpop.eup %801 }
 0x375   :  { %743 = vmatprep.subr.bf16.mxu0 %v813_v0  ;;  %v309_v62 = vmul.f32 %v802_v58, %v929_v17  ;;  %v108_v17 = vsel %vm104_vm3, %v915_v27, 0.0 }
 0x376   :  { %109 = vadd.xlane.f32.xlu0 %v108_v17 }
 0x398   :  { %v306_v11 = vpop.xlane.xlu1 %305 }
 0x399   :  { %803 = vrcp.f32 %v306_v11 }
 0x39c   :  { %v427_v56 = vpop.xlane.xlu1 %426 }
 0x39d   :  { %805 = vrcp.f32 %v427_v56 }
 0x39e   :  { %v424_v57 = vpop.xlane.xlu0 %423 }
 0x39f   :  { %807 = vrcp.f32 %v424_v57 }
 0x3a0   :  { %v548_v59 = vpop.xlane.xlu1 %547 }
 0x3a2   :  { %v545_v60 = vpop.xlane.xlu0 %544 }
 0x3a3   :  { %v804_v61 = vpop.eup %803  ;;  %809 = vrcp.f32 %v545_v60 }
 0x3a4   :  { %v310_v63 = vmul.f32 %v804_v61, %v788_v36  ;;  %811 = vrcp.f32 %v548_v59  ;;  %v434_v3 = vpop.permute.xlu1 %433 }
 0x3a6   :  { %v311_v1 = vpack.c.bf16 %v310_v63, %v309_v62  ;;  %v555_v12 = vpop.permute.xlu0 %554 }
 0x3a7   :  { %v806_v2 = vpop.eup %805 }
 0x3a8   :  { %734 = vmatmul.mubr.msk.bf16.vlgmr.msra.gmra.mrb[8].mxu0 %vm104_vm3, %v311_v1  ;;  %v431_v6 = vmul.f32 %v806_v2, %v790_v38 }
 0x3a9   :  { %v808_v4 = vpop.eup %807  ;;  %744 = vmatpush3.bf16.msra.mxu0 %v434_v3  ;;  %745 = vmatprep.mubr.msk.bf16.mxu0 %vm814_vm0, %v813_v0 }
 0x3aa   :  { %v430_v5 = vmul.f32 %v808_v4, %v792_v39  ;;  %755 = vmatprep.subr.bf16.mxu0 %v813_v0 }
 0x3ac   :  { %v432_v7 = vpack.c.bf16 %v431_v6, %v430_v5 }
 0x3ad   :  { %v810_v10 = vpop.eup %809 }
 0x3ae   :  { %v812_v13 = vpop.eup %811  ;;  %v551_v14 = vmul.f32 %v810_v10, %v796_v43 }
 0x3af   :  { %v552_v15 = vmul.f32 %v812_v13, %v937_v41 }
 0x3b0   :  { %746 = vmatmul.mubr.msk.bf16.vlgmr.msra.gmra.mrb[12].mxu0 %vm104_vm3, %v432_v7 }
 0x3b1   :  { %756 = vmatpush3.bf16.msra.mxu0 %v555_v12  ;;  %757 = vmatprep.mubr.msk.bf16.mxu0 %vm814_vm0, %v813_v0  ;;  %v553_v16 = vpack.c.bf16 %v552_v15, %v551_v14 }
 0x3b8   :  { %758 = vmatmul.mubr.msk.bf16.vlgmr.msra.gmra.mrb[16].mxu0 %vm104_vm3, %v553_v16 }
 0x3d5   :  { %v107_v35 = vpop.xlane.xlu1 %106 }
 0x3d6   :  { %vm111_vm4 = vcmp.gt.f32.partialorder %v107_v35, 0.0 }
 0x3d7   :  { %v668_v44 = vsel %vm111_vm4, 1.0, %v813_v0 }
 0x403   :  { %v110_v36 = vpop.xlane.xlu0 %109 }
 0x404   :  { %vm112_vm6 = vcmp.gt.f32.partialorder %v110_v36, 0.0 }
 0x405   :  { %v669_v48 = vsel %vm112_vm6, 1.0, %v813_v0 }
 0x446   :  { %v231_v19 = vpop.f32.mrb[4].mxu0 }
 0x447   :  { %v723_v20 = vpop.f32.mrb[5].mxu0 }
 0x448   :  { %v234_v21 = vpop.f32.mrb[6].mxu0 }
 0x449   :  { %v724_v22 = vpop.f32.mrb[7].mxu0 }
 0x47b   :  { %v352_v23 = vpop.f32.mrb[8].mxu0 }
 0x47c   :  { %603 = vrot.lane.b32.xlu0 %v352_v23, %s826_s6  ;;  %v735_v24 = vpop.f32.mrb[9].mxu0 }
 0x47d   :  { %v355_v25 = vpop.f32.mrb[10].mxu0 }
 0x47e   :  { %605 = vrot.lane.b32.xlu1 %v355_v25, %s826_s6  ;;  %v736_v28 = vpop.f32.mrb[11].mxu0 }
 0x483   :  { %v473_v29 = vpop.f32.mrb[12].mxu0 }
 0x484   :  { %611 = vrot.lane.b32.xlu1 %v473_v29, %s827_s7  ;;  %v747_v27 = vpop.f32.mrb[13].mxu0 }
 0x485   :  { %v476_v30 = vpop.f32.mrb[14].mxu0 }
 0x486   :  { %613 = vrot.lane.b32.xlu0 %v476_v30, %s827_s7  ;;  %v748_v26 = vpop.f32.mrb[15].mxu0 }
 0x48b   :  { %v594_v31 = vpop.f32.mrb[16].mxu0 }
 0x48c   :  { %619 = vrot.lane.b32.xlu1 %v594_v31, %s828_s8  ;;  %v759_v32 = vpop.f32.mrb[17].mxu0 }
 0x48d   :  { %v597_v33 = vpop.f32.mrb[18].mxu0 }
 0x48e   :  { %621 = vrot.lane.b32.xlu0 %v597_v33, %s828_s8  ;;  %v760_v34 = vpop.f32.mrb[19].mxu0 }
 0x490   :  { %636 = vrot.lane.b32.xlu1 %v877_v8, %s829_s9 }
 0x492   :  { %638 = vrot.lane.b32.xlu0 %v879_v9, %s829_s9 }
 0x4ee   :  { %v604_v38 = vpop.permute.xlu0 %603 }
 0x4ef   :  { %v625_v41 = vsel %vm120_vm2, %v231_v19, %v604_v38 }
 0x4f0   :  { %v606_v37 = vpop.permute.xlu1 %605 }
 0x4f1   :  { %v626_v8 = vsel %vm120_vm2, %v234_v21, %v606_v37 }
 0x4f6   :  { %v612_v39 = vpop.permute.xlu1 %611 }
 0x4f7   :  { %v627_v42 = vsel %vm104_vm3, %v625_v41, %v612_v39 }
 0x4f8   :  { %v614_v40 = vpop.permute.xlu0 %613 }
 0x4f9   :  { %v628_v9 = vsel %vm104_vm3, %v626_v8, %v614_v40 }
 0x4fe   :  { %v620_v43 = vpop.permute.xlu1 %619 }
 0x4ff   :  { %v630_v45 = vsel %vm629_vm5, %v627_v42, %v620_v43 }
 0x500   :  { %v622_v46 = vpop.permute.xlu0 %621  ;;  %v632_v47 = vmul.f32 %v668_v44, %v630_v45 }
 0x501   :  { %v631_v49 = vsel %vm629_vm5, %v628_v9, %v622_v46 }
 0x502   :  { %v637_v50 = vpop.permute.xlu1 %636  ;;  %v633_v51 = vmul.f32 %v669_v48, %v631_v49 }
 0x503   :  { %v642_v52 = vadd.f32 %v637_v50, %v632_v47 }
 0x504   :  { %v639_v53 = vpop.permute.xlu0 %638 }
 0x505   :  { %v644_v54 = vmax.f32 %v642_v52, 0.0  ;;  %v643_v55 = vadd.f32 %v639_v53, %v633_v51 }
 0x507   :  { %v680_v11 = vpack.c.bf16 %v644_v54, %v644_v54  ;;  %v645_v56 = vmax.f32 %v643_v55, 0.0 }
 0x509   :  { %655 = vst.msk [vmem:[%s982_s4] sm:$0xf] %vm654_vm7, %v680_v11  ;;  %v681_v57 = vpack.c.bf16 %v645_v56, %v645_v56 }
 0x50b   :  { %656 = vst.msk [vmem:[%s982_s4 + $0x4] sm:$0xf] %vm654_vm7, %v681_v57 }

// kernel: graph_transformer_forward.3
= control target key start
LH: loop header
LB: loop body
LE: loop exit
PB: predicated region body
PF: predicated region fallthrough
CT: control target
= control target key end

     0   :  { %vm37_vm0 = vcmask 1043456   ;;  %v794_v0 = vmov 0.0   ;;  %vm795_vm1 = vmmov 0   ;;  %vm33_vm2 = vcmask 64512   ;;  %s797_s20 = smov 96   ;;  %s798_s21 = smov 80   ;;  %s956_s1 = inlined_call_operand.vmem [shape: bf16[8,128], index: 1, kind: input, shape index: {}]   ;;  %s957_s0 = inlined_call_operand.vmem [shape: bf16[16,8], index: 0, kind: input, shape index: {}]   ;;  %s958_s2 = inlined_call_operand.vmem [shape: f32[1,128], index: 2, kind: input, shape index: {}]   ;;  %s959_s3 = inlined_call_operand.vmem [shape: s8[16,16], index: 3, kind: input, shape index: {}]   ;;  %s960_s4 = inlined_call_operand.vmem [shape: bf16[16,32], index: 4, kind: output, shape index: {}]  }
   0x1   :  { %690 = vmatprep.subr.bf16.mxu0 %v794_v0  ;;  %v20_v1 = vld [vmem:[%s956_s1] sm:$0xf]  ;;  %692 = vmatprep.mubr.msk.bf16.mxu0 %vm795_vm1, %v794_v0  ;;  %s800_s22 = smov 72   ;;  %s801_s23 = smov 112   ;;  %vm93_vm3 = vcmask 130048   ;;  %vm617_vm5 = vcmask 195584  }
   0x2   :  { %v39_v2 = vsel %vm37_vm0, %v20_v1, 0  ;;  %v761_v3 = vld [vmem:[%s957_s0] sm:$0xff]   ;;  %696 = vmatprep.subr.bf16.mxu1 %v794_v0  ;;  %698 = vmatprep.mubr.msk.bf16.mxu1 %vm795_vm1, %v794_v0  ;;  %s796_s0 = smov 120   ;;  %s802_s24 = smov 104   ;;  %vm642_vm7 = vcmask 257024  }
   0x3   :  { %691 = vmatpush3.bf16.msra.mxu0 %v39_v2  ;;  %v649_v4 = vld [vmem:[%s958_s2] ss:$0 sm:$0xff]  ;;  %s799_s2 = smov 88   ;;  %s804_s27 = smov 64  }
   0x4   :  { %702 = vmatprep.subr.bf16.mxu0 %v794_v0  ;;  %v669_v23 = vld [vmem:[%s959_s3] sm:$0xf]   ;;  %s803_s3 = smov 56   ;;  %s805_s28 = smov 48  }
   0x5   :  { %v670_v24 = vunpack.c.0.s8 %v669_v23  ;;  %v671_v25 = vunpack.c.1.s8 %v669_v23  ;;  %s806_s29 = smov 40   ;;  %s807_s30 = smov 8  }
   0x6   :  { %693 = vmatmul.mubr.msk.bf16.vlgmr.msra.gmra.mrb[0].mxu0 %vm33_vm2, %v761_v3  ;;  %s808_s5 = smov 16   ;;  %s809_s6 = smov 24  }
   0x7   :  { %704 = vmatprep.mubr.msk.bf16.mxu0 %vm795_vm1, %v794_v0  ;;  %v891_v26 = vcvt.s32.f32 %v670_v24  ;;  %v893_v27 = vcvt.s32.f32 %v671_v25  ;;  %s810_s7 = smov 32  }
   0x9   :  { %v652_v28 = vadd.f32 -1.0, %v891_v26  ;;  %v653_v29 = vadd.f32 -1.0, %v893_v27 }
   0xb   :  { %v91_v30 = vmul.f32 1e+30, %v652_v28  ;;  %v92_v31 = vmul.f32 1e+30, %v653_v29 }
  0xd9   :  { %v75_v5 = vpop.f32.mrb[0].mxu0 }
  0xda   :  { %v694_v6 = vpop.f32.mrb[1].mxu0  ;;  %v855_v8 = vadd.f32 %v649_v4, %v75_v5 }
  0xdb   :  { %v78_v7 = vpop.f32.mrb[2].mxu0 }
  0xdc   :  { %v857_v9 = vadd.f32 %v649_v4, %v78_v7  ;;  %v695_v10 = vpop.f32.mrb[3].mxu0 }
  0xde   :  { %v861_v11 = vpack.c.bf16 %v857_v9, %v855_v8 }
  0xe0   :  { %226 = vrot.lane.b32.xlu1 %v861_v11, %s796_s0  ;;  %107 = vrot.lane.b32.xlu0 %v861_v11, %s797_s20 }
  0xe4   :  { %349 = vrot.lane.b32.xlu1 %v861_v11, %s798_s21  ;;  %228 = vrot.lane.b32.xlu0 %v861_v11, %s799_s2 }
  0xe8   :  { %470 = vrot.lane.b32.xlu1 %v861_v11, %s800_s22  ;;  %347 = vrot.lane.b32.xlu0 %v861_v11, %s801_s23 }
  0xec   :  { %468 = vrot.lane.b32.xlu0 %v861_v11, %s802_s24 }
 0x152   :  { %v108_v12 = vpop.permute.xlu0 %107  ;;  %v227_v15 = vpop.permute.xlu1 %226 }
 0x153   :  { %v113_v13 = vsel %vm33_vm2, %v108_v12, 0 }
 0x154   :  { %697 = vmatpush3.bf16.xpose.msra.mxu1 %v113_v13 }
 0x155   :  { %708 = vmatprep.subr.bf16.mxu1 %v794_v0 }
 0x156   :  { %v229_v14 = vpop.permute.xlu0 %228  ;;  %v350_v17 = vpop.permute.xlu1 %349 }
 0x157   :  { %v234_v16 = vsel %vm33_vm2, %v229_v14, 0  ;;  %v355_v18 = vsel %vm33_vm2, %v350_v17, 0 }
 0x15a   :  { %v471_v19 = vpop.permute.xlu1 %470  ;;  %v348_v20 = vpop.permute.xlu0 %347 }
 0x15b   :  { %699 = vmatmul.mubr.msk.bf16.vlgmr.msra.gmra.mrb[0].mxu1 %vm33_vm2, %v861_v11  ;;  %v476_v21 = vsel %vm33_vm2, %v471_v19, 0 }
 0x15c   :  { %709 = vmatpush3.bf16.xpose.msra.mxu1 %v234_v16  ;;  %710 = vmatprep.mubr.msk.bf16.mxu1 %vm795_vm1, %v794_v0 }
 0x15d   :  { %720 = vmatprep.subr.bf16.mxu1 %v794_v0 }
 0x15e   :  { %v469_v22 = vpop.permute.xlu0 %468 }
 0x163   :  { %711 = vmatmul.mubr.msk.bf16.vlgmr.msra.gmra.mrb[4].mxu1 %vm33_vm2, %v227_v15 }
 0x164   :  { %721 = vmatpush3.bf16.xpose.msra.mxu1 %v355_v18  ;;  %722 = vmatprep.mubr.msk.bf16.mxu1 %vm795_vm1, %v794_v0 }
 0x165   :  { %732 = vmatprep.subr.bf16.mxu1 %v794_v0 }
 0x16b   :  { %723 = vmatmul.mubr.msk.bf16.vlgmr.msra.gmra.mrb[8].mxu1 %vm33_vm2, %v348_v20 }
 0x16c   :  { %733 = vmatpush3.bf16.xpose.msra.mxu1 %v476_v21  ;;  %734 = vmatprep.mubr.msk.bf16.mxu1 %vm795_vm1, %v794_v0 }
 0x173   :  { %735 = vmatmul.mubr.msk.bf16.vlgmr.msra.gmra.mrb[12].mxu1 %vm33_vm2, %v469_v22 }
 0x22e   :  { %v149_v32 = vpop.f32.mrb[0].mxu1 }
 0x22f   :  { %v150_v33 = vadd.f32 %v149_v32, %v91_v30  ;;  %v700_v34 = vpop.f32.mrb[1].mxu1 }
 0x230   :  { %v152_v35 = vpop.f32.mrb[2].mxu1 }
 0x231   :  { %v153_v36 = vadd.f32 %v152_v35, %v92_v31  ;;  %v701_v37 = vpop.f32.mrb[3].mxu1  ;;  %v156_v38 = vsel %vm93_vm3, %v150_v33, -inf }
 0x232   :  { %157 = vmax.xlane.f32.xlu1 %v156_v38 }
 0x233   :  { %v159_v39 = vsel %vm93_vm3, %v153_v36, -inf }
 0x234   :  { %160 = vmax.xlane.f32.xlu0 %v159_v39 }
 0x236   :  { %v270_v40 = vpop.f32.mrb[4].mxu1 }
 0x237   :  { %v271_v41 = vadd.f32 %v270_v40, %v91_v30  ;;  %v712_v42 = vpop.f32.mrb[5].mxu1 }
 0x238   :  { %v273_v43 = vpop.f32.mrb[6].mxu1 }
 0x239   :  { %v274_v44 = vadd.f32 %v273_v43, %v92_v31  ;;  %v713_v45 = vpop.f32.mrb[7].mxu1  ;;  %v277_v46 = vsel %vm93_vm3, %v271_v41, -inf }
 0x23a   :  { %278 = vmax.xlane.f32.xlu0 %v277_v46 }
 0x23b   :  { %v280_v47 = vsel %vm93_vm3, %v274_v44, -inf }
 0x23c   :  { %281 = vmax.xlane.f32.xlu1 %v280_v47 }
 0x23e   :  { %v391_v48 = vpop.f32.mrb[8].mxu1 }
 0x23f   :  { %v392_v49 = vadd.f32 %v391_v48, %v91_v30  ;;  %v724_v50 = vpop.f32.mrb[9].mxu1 }
 0x240   :  { %v394_v51 = vpop.f32.mrb[10].mxu1 }
 0x241   :  { %v395_v52 = vadd.f32 %v394_v51, %v92_v31  ;;  %v725_v53 = vpop.f32.mrb[11].mxu1  ;;  %v398_v54 = vsel %vm93_vm3, %v392_v49, -inf }
 0x242   :  { %399 = vmax.xlane.f32.xlu0 %v398_v54 }
 0x243   :  { %v401_v55 = vsel %vm93_vm3, %v395_v52, -inf }
 0x244   :  { %402 = vmax.xlane.f32.xlu1 %v401_v55 }
 0x246   :  { %v512_v56 = vpop.f32.mrb[12].mxu1 }
 0x247   :  { %v513_v57 = vadd.f32 %v512_v56, %v91_v30  ;;  %v736_v58 = vpop.f32.mrb[13].mxu1 }
 0x248   :  { %v515_v59 = vpop.f32.mrb[14].mxu1 }
 0x249   :  { %v516_v60 = vadd.f32 %v515_v59, %v92_v31  ;;  %v737_v61 = vpop.f32.mrb[15].mxu1  ;;  %v519_v62 = vsel %vm93_vm3, %v513_v57, -inf }
 0x24a   :  { %520 = vmax.xlane.f32.xlu0 %v519_v62 }
 0x24b   :  { %v522_v63 = vsel %vm93_vm3, %v516_v60, -inf }
 0x24c   :  { %523 = vmax.xlane.f32.xlu1 %v522_v63 }
 0x2bf   :  { %v158_v1 = vpop.xlane.xlu1 %157 }
 0x2c0   :  { %v162_v2 = vsub.f32 %v150_v33, %v158_v1 }
 0x2c1   :  { %v161_v3 = vpop.xlane.xlu0 %160 }
 0x2c2   :  { %v164_v4 = vmul.f32 1.442695, %v162_v2  ;;  %v163_v5 = vsub.f32 %v153_v36, %v161_v3 }
 0x2c4   :  { %762 = vpow2.f32 %v164_v4  ;;  %v166_v6 = vmul.f32 1.442695, %v163_v5 }
 0x2c6   :  { %764 = vpow2.f32 %v166_v6 }
 0x2c7   :  { %v279_v7 = vpop.xlane.xlu0 %278 }
 0x2c8   :  { %v283_v10 = vsub.f32 %v271_v41, %v279_v7 }
 0x2c9   :  { %v282_v19 = vpop.xlane.xlu1 %281 }
 0x2ca   :  { %v285_v12 = vmul.f32 1.442695, %v283_v10  ;;  %v284_v20 = vsub.f32 %v274_v44, %v282_v19 }
 0x2cc   :  { %766 = vpow2.f32 %v285_v12  ;;  %v287_v23 = vmul.f32 1.442695, %v284_v20 }
 0x2ce   :  { %v763_v13 = vpop.eup %762  ;;  %768 = vpow2.f32 %v287_v23 }
 0x2cf   :  { %v168_v14 = vsel %vm93_vm3, %v763_v13, 0.0  ;;  %v400_v22 = vpop.xlane.xlu0 %399 }
 0x2d0   :  { %v765_v15 = vpop.eup %764  ;;  %169 = vadd.xlane.f32.xlu0 %v168_v14  ;;  %v404_v28 = vsub.f32 %v392_v49, %v400_v22 }
 0x2d1   :  { %v171_v16 = vsel %vm93_vm3, %v765_v15, 0.0  ;;  %v403_v21 = vpop.xlane.xlu1 %402 }
 0x2d2   :  { %172 = vadd.xlane.f32.xlu1 %v171_v16  ;;  %v405_v24 = vsub.f32 %v395_v52, %v403_v21  ;;  %v406_v32 = vmul.f32 1.442695, %v404_v28 }
 0x2d4   :  { %v408_v30 = vmul.f32 1.442695, %v405_v24 }
 0x2d6   :  { %v907_v17 = vpop.eup %766  ;;  %770 = vpow2.f32 %v408_v30 }
 0x2d7   :  { %v289_v18 = vsel %vm93_vm3, %v907_v17, 0.0  ;;  %v521_v29 = vpop.xlane.xlu0 %520  ;;  %772 = vpow2.f32 %v406_v32 }
 0x2d8   :  { %290 = vadd.xlane.f32.xlu0 %v289_v18  ;;  %v525_v33 = vsub.f32 %v513_v57, %v521_v29  ;;  %v769_v36 = vpop.eup %768  ;;  %v94_v18 = vsel %vm93_vm3, %v891_v26, 0.0 }
 0x2d9   :  { %v524_v25 = vpop.xlane.xlu1 %523  ;;  %v292_v37 = vsel %vm93_vm3, %v769_v36, 0.0 }
 0x2da   :  { %v526_v31 = vsub.f32 %v516_v60, %v524_v25  ;;  %v527_v35 = vmul.f32 1.442695, %v525_v33 }
 0x2dc   :  { %v529_v34 = vmul.f32 1.442695, %v526_v31 }
 0x2de   :  { %774 = vpow2.f32 %v529_v34 }
 0x2df   :  { %776 = vpow2.f32 %v527_v35 }
 0x2e0   :  { %v771_v38 = vpop.eup %770 }
 0x2e1   :  { %v773_v39 = vpop.eup %772  ;;  %v413_v40 = vsel %vm93_vm3, %v771_v38, 0.0 }
 0x2e2   :  { %v410_v42 = vsel %vm93_vm3, %v773_v39, 0.0 }
 0x2e3   :  { %300 = vrot.lane.b32.xlu1 %v861_v11, %s803_s3 }
 0x2e8   :  { %v915_v41 = vpop.eup %774 }
 0x2e9   :  { %v777_v43 = vpop.eup %776  ;;  %v534_v44 = vsel %vm93_vm3, %v915_v41, 0.0 }
 0x2ea   :  { %v531_v45 = vsel %vm93_vm3, %v777_v43, 0.0 }
 0x2ee   :  { %179 = vrot.lane.b32.xlu0 %v861_v11, %s804_s27 }
 0x307   :  { %293 = vadd.xlane.f32.xlu1 %v292_v37 }
 0x30b   :  { %414 = vadd.xlane.f32.xlu1 %v413_v40 }
 0x30d   :  { %411 = vadd.xlane.f32.xlu0 %v410_v42 }
 0x30f   :  { %535 = vadd.xlane.f32.xlu1 %v534_v44 }
 0x311   :  { %532 = vadd.xlane.f32.xlu0 %v531_v45 }
 0x320   :  { %421 = vrot.lane.b32.xlu1 %v861_v11, %s805_s28 }
 0x327   :  { %542 = vrot.lane.b32.xlu0 %v861_v11, %s806_s29 }
 0x344   :  { %95 = vadd.xlane.f32.xlu1 %v94_v18 }
 0x35d   :  { %v170_v46 = vpop.xlane.xlu0 %169 }
 0x35e   :  { %778 = vrcp.f32 %v170_v46 }
 0x35f   :  { %v173_v47 = vpop.xlane.xlu1 %172 }
 0x360   :  { %780 = vrcp.f32 %v173_v47 }
 0x363   :  { %v301_v55 = vpop.permute.xlu1 %300 }
 0x365   :  { %v291_v48 = vpop.xlane.xlu0 %290 }
 0x366   :  { %782 = vrcp.f32 %v291_v48 }
 0x368   :  { %v779_v49 = vpop.eup %778 }
 0x369   :  { %v180_v50 = vpop.permute.xlu0 %179  ;;  %v176_v52 = vmul.f32 %v779_v49, %v763_v13 }
 0x36a   :  { %v781_v51 = vpop.eup %780  ;;  %703 = vmatpush3.bf16.msra.mxu0 %v180_v50 }
 0x36b   :  { %v177_v53 = vmul.f32 %v781_v51, %v765_v15  ;;  %714 = vmatprep.subr.bf16.mxu0 %v794_v0 }
 0x36d   :  { %v178_v54 = vpack.c.bf16 %v177_v53, %v176_v52 }
 0x36f   :  { %705 = vmatmul.mubr.msk.bf16.vlgmr.msra.gmra.mrb[4].mxu0 %vm93_vm3, %v178_v54 }
 0x370   :  { %715 = vmatpush3.bf16.msra.mxu0 %v301_v55  ;;  %716 = vmatprep.mubr.msk.bf16.mxu0 %vm795_vm1, %v794_v0  ;;  %v783_v58 = vpop.eup %782 }
 0x371   :  { %726 = vmatprep.subr.bf16.mxu0 %v794_v0  ;;  %v297_v62 = vmul.f32 %v783_v58, %v907_v17  ;;  %v97_v17 = vsel %vm93_vm3, %v893_v27, 0.0 }
 0x372   :  { %98 = vadd.xlane.f32.xlu0 %v97_v17 }
 0x394   :  { %v294_v11 = vpop.xlane.xlu1 %293 }
 0x395   :  { %784 = vrcp.f32 %v294_v11 }
 0x398   :  { %v415_v56 = vpop.xlane.xlu1 %414 }
 0x399   :  { %786 = vrcp.f32 %v415_v56 }
 0x39a   :  { %v412_v57 = vpop.xlane.xlu0 %411 }
 0x39b   :  { %788 = vrcp.f32 %v412_v57 }
 0x39c   :  { %v536_v59 = vpop.xlane.xlu1 %535 }
 0x39e   :  { %v533_v60 = vpop.xlane.xlu0 %532 }
 0x39f   :  { %v785_v61 = vpop.eup %784  ;;  %790 = vrcp.f32 %v533_v60 }
 0x3a0   :  { %v298_v63 = vmul.f32 %v785_v61, %v769_v36  ;;  %792 = vrcp.f32 %v536_v59  ;;  %v422_v3 = vpop.permute.xlu1 %421 }
 0x3a2   :  { %v299_v1 = vpack.c.bf16 %v298_v63, %v297_v62  ;;  %v543_v12 = vpop.permute.xlu0 %542 }
 0x3a3   :  { %v787_v2 = vpop.eup %786 }
 0x3a4   :  { %717 = vmatmul.mubr.msk.bf16.vlgmr.msra.gmra.mrb[8].mxu0 %vm93_vm3, %v299_v1  ;;  %v419_v6 = vmul.f32 %v787_v2, %v771_v38 }
 0x3a5   :  { %v789_v4 = vpop.eup %788  ;;  %727 = vmatpush3.bf16.msra.mxu0 %v422_v3  ;;  %728 = vmatprep.mubr.msk.bf16.mxu0 %vm795_vm1, %v794_v0 }
 0x3a6   :  { %v418_v5 = vmul.f32 %v789_v4, %v773_v39  ;;  %738 = vmatprep.subr.bf16.mxu0 %v794_v0 }
 0x3a8   :  { %v420_v7 = vpack.c.bf16 %v419_v6, %v418_v5 }
 0x3a9   :  { %v791_v10 = vpop.eup %790 }
 0x3aa   :  { %v793_v13 = vpop.eup %792  ;;  %v539_v14 = vmul.f32 %v791_v10, %v777_v43 }
 0x3ab   :  { %v540_v15 = vmul.f32 %v793_v13, %v915_v41 }
 0x3ac   :  { %729 = vmatmul.mubr.msk.bf16.vlgmr.msra.gmra.mrb[12].mxu0 %vm93_vm3, %v420_v7 }
 0x3ad   :  { %739 = vmatpush3.bf16.msra.mxu0 %v543_v12  ;;  %740 = vmatprep.mubr.msk.bf16.mxu0 %vm795_vm1, %v794_v0  ;;  %v541_v16 = vpack.c.bf16 %v540_v15, %v539_v14 }
 0x3b4   :  { %741 = vmatmul.mubr.msk.bf16.vlgmr.msra.gmra.mrb[16].mxu0 %vm93_vm3, %v541_v16 }
 0x3d1   :  { %v96_v35 = vpop.xlane.xlu1 %95 }
 0x3d2   :  { %vm100_vm4 = vcmp.gt.f32.partialorder %v96_v35, 0.0 }
 0x3d3   :  { %v654_v44 = vsel %vm100_vm4, 1.0, %v794_v0 }
 0x3ff   :  { %v99_v36 = vpop.xlane.xlu0 %98 }
 0x400   :  { %vm101_vm6 = vcmp.gt.f32.partialorder %v99_v36, 0.0 }
 0x401   :  { %v655_v48 = vsel %vm101_vm6, 1.0, %v794_v0 }
 0x442   :  { %v219_v19 = vpop.f32.mrb[4].mxu0 }
 0x443   :  { %v706_v20 = vpop.f32.mrb[5].mxu0 }
 0x444   :  { %v222_v21 = vpop.f32.mrb[6].mxu0 }
 0x445   :  { %v707_v22 = vpop.f32.mrb[7].mxu0 }
 0x477   :  { %v340_v23 = vpop.f32.mrb[8].mxu0 }
 0x478   :  { %591 = vrot.lane.b32.xlu0 %v340_v23, %s807_s30  ;;  %v718_v24 = vpop.f32.mrb[9].mxu0 }
 0x479   :  { %v343_v25 = vpop.f32.mrb[10].mxu0 }
 0x47a   :  { %593 = vrot.lane.b32.xlu1 %v343_v25, %s807_s30  ;;  %v719_v28 = vpop.f32.mrb[11].mxu0 }
 0x47f   :  { %v461_v29 = vpop.f32.mrb[12].mxu0 }
 0x480   :  { %599 = vrot.lane.b32.xlu1 %v461_v29, %s808_s5  ;;  %v730_v27 = vpop.f32.mrb[13].mxu0 }
 0x481   :  { %v464_v30 = vpop.f32.mrb[14].mxu0 }
 0x482   :  { %601 = vrot.lane.b32.xlu0 %v464_v30, %s808_s5  ;;  %v731_v26 = vpop.f32.mrb[15].mxu0 }
 0x487   :  { %v582_v31 = vpop.f32.mrb[16].mxu0 }
 0x488   :  { %607 = vrot.lane.b32.xlu1 %v582_v31, %s809_s6  ;;  %v742_v32 = vpop.f32.mrb[17].mxu0 }
 0x489   :  { %v585_v33 = vpop.f32.mrb[18].mxu0 }
 0x48a   :  { %609 = vrot.lane.b32.xlu0 %v585_v33, %s809_s6  ;;  %v743_v34 = vpop.f32.mrb[19].mxu0 }
 0x48c   :  { %624 = vrot.lane.b32.xlu1 %v855_v8, %s810_s7 }
 0x48e   :  { %626 = vrot.lane.b32.xlu0 %v857_v9, %s810_s7 }
 0x4ea   :  { %v592_v38 = vpop.permute.xlu0 %591 }
 0x4eb   :  { %v613_v41 = vsel %vm33_vm2, %v219_v19, %v592_v38 }
 0x4ec   :  { %v594_v37 = vpop.permute.xlu1 %593 }
 0x4ed   :  { %v614_v8 = vsel %vm33_vm2, %v222_v21, %v594_v37 }
 0x4f2   :  { %v600_v39 = vpop.permute.xlu1 %599 }
 0x4f3   :  { %v615_v42 = vsel %vm93_vm3, %v613_v41, %v600_v39 }
 0x4f4   :  { %v602_v40 = vpop.permute.xlu0 %601 }
 0x4f5   :  { %v616_v9 = vsel %vm93_vm3, %v614_v8, %v602_v40 }
 0x4fa   :  { %v608_v43 = vpop.permute.xlu1 %607 }
 0x4fb   :  { %v618_v45 = vsel %vm617_vm5, %v615_v42, %v608_v43 }
 0x4fc   :  { %v610_v46 = vpop.permute.xlu0 %609  ;;  %v620_v47 = vmul.f32 %v654_v44, %v618_v45 }
 0x4fd   :  { %v619_v49 = vsel %vm617_vm5, %v616_v9, %v610_v46 }
 0x4fe   :  { %v625_v50 = vpop.permute.xlu1 %624  ;;  %v621_v51 = vmul.f32 %v655_v48, %v619_v49 }
 0x4ff   :  { %v630_v52 = vadd.f32 %v625_v50, %v620_v47 }
 0x500   :  { %v627_v53 = vpop.permute.xlu0 %626 }
 0x501   :  { %v632_v54 = vmax.f32 %v630_v52, 0.0  ;;  %v631_v55 = vadd.f32 %v627_v53, %v621_v51 }
 0x503   :  { %v666_v11 = vpack.c.bf16 %v632_v54, %v632_v54  ;;  %v633_v56 = vmax.f32 %v631_v55, 0.0 }
 0x505   :  { %643 = vst.msk [vmem:[%s960_s4] sm:$0xf] %vm642_vm7, %v666_v11  ;;  %v667_v57 = vpack.c.bf16 %v633_v56, %v633_v56 }
 0x507   :  { %644 = vst.msk [vmem:[%s960_s4 + $0x4] sm:$0xf] %vm642_vm7, %v667_v57 }

</bundles_post_ra>
